<compile_context>
chip_gen: v7x
topology: tpu7x:2x2x1
jax: 0.10.0
libtpu: 0.0.40
codegen_flags: <defaults>
</compile_context>

<pallas_src>
import math

import jax
import jax.numpy as jnp
from jax.experimental import pallas as pl
from jax.experimental.pallas import tpu as pltpu  # noqa: F401

# ---- scaled-down config (768 -> 32 etc.) ------------------------------------
H = 32          # hidden size (stand-in for PhoBERT's 768)
S = 8           # sequence length
B = 2           # batch
FF = 64         # FFN intermediate size
NUM_LABEL = 3
VOCAB = 64
NSEQ = 4        # p, c1, c2, c3
NB = NSEQ * B   # sequences per forward pass (8)
T = NB * S      # total token rows (64)
EPS = 1e-5
LANES = 128

# bias slab rows (row-aligned: every bias starts at lane 0 of its own row)
_BROW = dict(bqkv=(0, 3 * H), bo=(1, H), ln1g=(2, H), ln1b=(3, H),
             b1=(4, FF), b2=(5, H), ln2g=(6, H), ln2b=(7, H), bp=(8, H),
             dense_b=(9, NUM_LABEL))


# ----------------------------- kernel -----------------------------------------
def _ln(x, g, b):
    mu = jnp.mean(x, axis=-1, keepdims=True)
    var = jnp.mean((x - mu) ** 2, axis=-1, keepdims=True)
    return (x - mu) * jax.lax.rsqrt(var + EPS) * g + b


def pcsa_fused_kernel(tok_ref, emb_ref, wqkv_ref, wmats_ref, w2_ref,
                      bslab_ref, const_ref, dw_ref, out_ref):
    """Whole forward pass for all NSEQ*B sequences -> (B, NUM_LABEL) logits."""
    bslab = bslab_ref[...]                                  # (10, 128)

    def bias(name):
        r, sz = _BROW[name]
        return bslab[r:r + 1, 0:sz]                         # (1, sz), lane-0 aligned

    wmats = wmats_ref[...]                                  # (H, 128) = [wo | w1 | wp]
    wo = wmats[:, 0:H]
    w1 = wmats[:, H:H + FF]
    wp = wmats[:, H + FF:2 * H + FF]

    amask = const_ref[0:T, :]                               # (64, 64) additive mask
    csel = const_ref[T:T + NB, :]                           # (8, 64) CLS-row selector

    # --- embedding lookup fused in-kernel: one-hot @ table (one MXU push) ------
    # TODO(synk): attention_mask assumed all-ones (no padding masking).
    tok = tok_ref[...]                                      # (T, 1) int32
    vocab_iota = jax.lax.broadcasted_iota(jnp.int32, (T, VOCAB), 1)
    onehot = (vocab_iota == tok).astype(jnp.float32)        # (T, VOCAB)
    x = jnp.dot(onehot, emb_ref[...], preferred_element_type=jnp.float32)   # (T, H)

    # --- fused QKV projection: one (64,32)@(32,96) matmul -----------------------
    # TODO(synk): PhoBERT is 12 heads / 12 layers; single head / layer stand-in.
    qkv = jnp.dot(x, wqkv_ref[...],
                  preferred_element_type=jnp.float32) + bias("bqkv")        # (T, 3H)
    q = qkv[:, 0:H]
    k = qkv[:, H:2 * H]
    v = qkv[:, 2 * H:3 * H]

    # --- flattened single-head attention over all 8 sequences -------------------
    # block-diagonal mask keeps tokens of different sequences from attending.
    scores = jax.lax.dot_general(q, k, (((1,), (1,)), ((), ())),
                                 preferred_element_type=jnp.float32)        # (T, T)
    scores = scores * (1.0 / math.sqrt(H)) + amask
    scores = scores - jnp.max(scores, axis=-1, keepdims=True)
    e = jnp.exp(scores)
    attn = e * pl.reciprocal(jnp.sum(e, axis=-1, keepdims=True), approx=True)
    ctx = jnp.dot(attn, v, preferred_element_type=jnp.float32)              # (T, H)

    attn_out = jnp.dot(ctx, wo, preferred_element_type=jnp.float32) + bias("bo")
    h = _ln(x + attn_out, bias("ln1g"), bias("ln1b"))

    # --- FFN ---------------------------------------------------------------------
    # TODO(synk): jax.nn.gelu (tanh approx) vs HF's exact erf GELU; matches the
    # in-script reference, would differ slightly from real PhoBERT weights.
    ff = jnp.dot(h, w1, preferred_element_type=jnp.float32) + bias("b1")
    ff = jax.nn.gelu(ff)
    ff = jnp.dot(ff, w2_ref[...], preferred_element_type=jnp.float32) + bias("b2")
    h2 = _ln(h + ff, bias("ln2g"), bias("ln2b"))                            # (T, H)

    # --- BERT pooler on the [CLS] row of every sequence (constant selector) -----
    cls = jnp.dot(csel, h2, preferred_element_type=jnp.float32)             # (NB, H)
    pooled = jnp.tanh(jnp.dot(cls, wp, preferred_element_type=jnp.float32)
                      + bias("bp"))                                         # (NB, H)

    # --- concat(p, c1, c2, c3) in-register -> lane-dense (B, 4H) = (2, 128) ------
    # pooled row = n*B + b, so each per-n block is a contiguous 2-row slice.
    fused = jnp.concatenate(
        [pooled[n * B:(n + 1) * B, :] for n in range(NSEQ)], axis=1)        # (B, 4H)

    # --- dropout(p=0) is identity; fusion dense (2,128)@(128,num_label) ----------
    out_ref[...] = (jnp.dot(fused, dw_ref[...], preferred_element_type=jnp.float32)
                    + bias("dense_b"))


# ----------------------------- param packing (ONCE, at load time) ---------------
def pack_params(params):
    """Pack the many tiny parameters into a few VMEM slabs, outside the per-call graph."""
    enc = params["enc"]
    wqkv = jnp.concatenate([enc["wq"], enc["wk"], enc["wv"]], axis=1)       # (H, 3H)
    wmats = jnp.concatenate([enc["wo"], enc["w1"], enc["wp"]], axis=1)      # (H, 128)

    def row(v):
        v = jnp.reshape(v, (1, -1)).astype(jnp.float32)
        return jnp.pad(v, ((0, 0), (0, LANES - v.shape[1])))

    bslab = jnp.concatenate([
        row(jnp.concatenate([enc["bq"], enc["bk"], enc["bv"]], axis=1)),    # bqkv
        row(enc["bo"]), row(enc["ln1g"]), row(enc["ln1b"]),
        row(enc["b1"]), row(enc["b2"]),
        row(enc["ln2g"]), row(enc["ln2b"]), row(enc["bp"]),
        row(params["dense_b"]),
    ], axis=0)                                                              # (10, 128)

    # constants: block-diagonal additive attention mask + CLS-row selector
    idx = jnp.arange(T, dtype=jnp.int32)
    amask = jnp.where((idx[:, None] // S) == (idx[None, :] // S),
                      0.0, -1e9).astype(jnp.float32)                        # (T, T)
    csel = (idx[None, :] == (jnp.arange(NB, dtype=jnp.int32) * S)[:, None]
            ).astype(jnp.float32)                                           # (NB, T)
    const = jnp.concatenate([amask, csel], axis=0)                          # (T+NB, T)

    return dict(emb=params["emb"], wqkv=wqkv, wmats=wmats, w2=enc["w2"],
                bslab=bslab, const=const, dense_w=params["dense_w"])


# ----------------------------- wrapper -----------------------------------------
@jax.jit
def model_forward(p_tok, c1_tok, c2_tok, c3_tok, packed):
    """Mirrors PCSA_Concat_Fusion_Model.forward (scaled-down synthetic BERT)."""
    # row order = [p_b0, p_b1, c1_b0, c1_b1, ...] -> sequence index i = n*B + b,
    # matching torch.cat((p, c1, c2, c3), dim=1) at the end.
    toks = jnp.concatenate([p_tok, c1_tok, c2_tok, c3_tok], axis=0)         # (NB, S)
    toks = toks.reshape(T, 1).astype(jnp.int32)

    return pl.pallas_call(
        pcsa_fused_kernel,
        out_shape=jax.ShapeDtypeStruct((B, NUM_LABEL), jnp.float32),
    )(toks, packed["emb"], packed["wqkv"], packed["wmats"], packed["w2"],
      packed["bslab"], packed["const"], packed["dense_w"])


# ------------------------- pure-JAX reference -----------------------------------
def reference_forward(p_tok, c1_tok, c2_tok, c3_tok, params):
    enc = params["enc"]

    def one_seq(tok):                                                       # tok: (S,)
        x = jnp.take(params["emb"], tok, axis=0).astype(jnp.float32)        # (S, H)
        q = x @ enc["wq"] + enc["bq"]
        k = x @ enc["wk"] + enc["bk"]
        v = x @ enc["wv"] + enc["bv"]
        sc = (q @ k.T) / math.sqrt(H)
        attn = jax.nn.softmax(sc, axis=-1)
        h = attn @ v @ enc["wo"] + enc["bo"]

        def ln(y, g, b):
            mu = jnp.mean(y, -1, keepdims=True)
            var = jnp.mean((y - mu) ** 2, -1, keepdims=True)
            return (y - mu) / jnp.sqrt(var + EPS) * g + b

        h = ln(x + h, enc["ln1g"], enc["ln1b"])
        ff = jax.nn.gelu(h @ enc["w1"] + enc["b1"]) @ enc["w2"] + enc["b2"]
        h2 = ln(h + ff, enc["ln2g"], enc["ln2b"])
        return jnp.tanh(h2[0] @ enc["wp"] + enc["bp"][0])                   # (H,)

    pools = [jax.vmap(one_seq)(t) for t in (p_tok, c1_tok, c2_tok, c3_tok)]
    fused = jnp.concatenate(pools, axis=1)                                  # (B, 4H)
    return fused @ params["dense_w"] + params["dense_b"]


# ----------------------------- param init ---------------------------------------
def init_params(key):
    ks = jax.random.split(key, 24)

    def w(k, shape, s=0.05):
        return (s * jax.random.normal(k, shape)).astype(jnp.float32)

    enc = dict(
        wq=w(ks[0], (H, H)),  bq=w(ks[9],  (1, H), 0.02),
        wk=w(ks[1], (H, H)),  bk=w(ks[10], (1, H), 0.02),
        wv=w(ks[2], (H, H)),  bv=w(ks[11], (1, H), 0.02),
        wo=w(ks[3], (H, H)),  bo=w(ks[12], (1, H), 0.02),
        ln1g=(1.0 + w(ks[13], (1, H), 0.02)).astype(jnp.float32),
        ln1b=w(ks[14], (1, H), 0.02),
        w1=w(ks[4], (H, FF)), b1=w(ks[15], (1, FF), 0.02),
        w2=w(ks[5], (FF, H)), b2=w(ks[16], (1, H), 0.02),
        ln2g=(1.0 + w(ks[17], (1, H), 0.02)).astype(jnp.float32),
        ln2b=w(ks[18], (1, H), 0.02),
        wp=w(ks[6], (H, H)),  bp=w(ks[19], (1, H), 0.02),
    )
    return dict(
        emb=w(ks[7], (VOCAB, H)),
        enc=enc,
        dense_w=w(ks[8], (NSEQ * H, NUM_LABEL)),   # nn.Linear(768*4, num_label)
        dense_b=w(ks[20], (1, NUM_LABEL), 0.02),
    )


# --------------------------------- main ------------------------------------------
if __name__ == "__main__":
    key = jax.random.PRNGKey(0)
    kp, kc1, kc2, kc3, kw = jax.random.split(key, 5)
    p_tok = jax.random.randint(kp, (B, S), 0, VOCAB)
    c1_tok = jax.random.randint(kc1, (B, S), 0, VOCAB)
    c2_tok = jax.random.randint(kc2, (B, S), 0, VOCAB)
    c3_tok = jax.random.randint(kc3, (B, S), 0, VOCAB)

    params = init_params(kw)
    packed = pack_params(params)          # packed ONCE, outside the per-call graph

    logits = model_forward(p_tok, c1_tok, c2_tok, c3_tok, packed)
    logits = jax.block_until_ready(logits)

    ref = reference_forward(p_tok, c1_tok, c2_tok, c3_tok, params)
    assert logits.shape == (B, NUM_LABEL)
    assert jnp.allclose(logits, ref, atol=1e-4, rtol=1e-4), (
        f"mismatch: {logits} vs {ref}")

    print("KERNEL_OK")
</pallas_src>

<mosaic_0001>
module attributes {stable_mosaic.version = 11 : i64} {
  func.func @pcsa_fused_kernel(%arg0: memref<64x1xi32, #tpu.memory_space<vmem>>, %arg1: memref<64x32xf32, #tpu.memory_space<vmem>>, %arg2: memref<32x96xf32, #tpu.memory_space<vmem>>, %arg3: memref<32x128xf32, #tpu.memory_space<vmem>>, %arg4: memref<64x32xf32, #tpu.memory_space<vmem>>, %arg5: memref<10x128xf32, #tpu.memory_space<vmem>>, %arg6: memref<72x64xf32, #tpu.memory_space<vmem>>, %arg7: memref<128x3xf32, #tpu.memory_space<vmem>>, %arg8: memref<2x3xf32, #tpu.memory_space<vmem>>) attributes {dimension_semantics = [], scalar_prefetch = 0 : i64, scratch_operands = 0 : i64, tpu.core_type = #tpu.core_type<tc>} {
    %c0 = arith.constant 0 : index
    %c0_0 = arith.constant 0 : index
    %0 = vector.load %arg5[%c0, %c0_0] : memref<10x128xf32, #tpu.memory_space<vmem>>, vector<10x128xf32>
    %c0_1 = arith.constant 0 : index
    %c0_2 = arith.constant 0 : index
    %1 = vector.load %arg3[%c0_1, %c0_2] : memref<32x128xf32, #tpu.memory_space<vmem>>, vector<32x128xf32>
    %2 = vector.extract_strided_slice %1 {offsets = [0, 0], sizes = [32, 32], strides = [1, 1]} : vector<32x128xf32> to vector<32x32xf32>
    %3 = vector.extract_strided_slice %1 {offsets = [0, 32], sizes = [32, 64], strides = [1, 1]} : vector<32x128xf32> to vector<32x64xf32>
    %4 = vector.extract_strided_slice %1 {offsets = [0, 96], sizes = [32, 32], strides = [1, 1]} : vector<32x128xf32> to vector<32x32xf32>
    %c0_3 = arith.constant 0 : index
    %c0_4 = arith.constant 0 : index
    %5 = vector.load %arg6[%c0_3, %c0_4] : memref<72x64xf32, #tpu.memory_space<vmem>>, vector<64x64xf32>
    %c64 = arith.constant 64 : index
    %c0_5 = arith.constant 0 : index
    %6 = vector.load %arg6[%c64, %c0_5] : memref<72x64xf32, #tpu.memory_space<vmem>>, vector<8x64xf32>
    %c0_6 = arith.constant 0 : index
    %c0_7 = arith.constant 0 : index
    %7 = vector.load %arg0[%c0_6, %c0_7] : memref<64x1xi32, #tpu.memory_space<vmem>>, vector<64x1xi32>
    %8 = tpu.iota {dimensions = array<i32: 1>} : vector<64x64xi32>
    %9 = vector.broadcast %7 : vector<64x1xi32> to vector<64x64xi32>
    %10 = arith.cmpi eq, %8, %9 : vector<64x64xi32>
    %11 = arith.extui %10 : vector<64x64xi1> to vector<64x64xi32>
    %12 = arith.sitofp %11 : vector<64x64xi32> to vector<64x64xf32>
    %c0_8 = arith.constant 0 : index
    %c0_9 = arith.constant 0 : index
    %13 = vector.load %arg1[%c0_8, %c0_9] : memref<64x32xf32, #tpu.memory_space<vmem>>, vector<64x32xf32>
    %cst = arith.constant dense<0.000000e+00> : vector<64x32xf32>
    %14 = tpu.matmul %12, %13, %cst {dimension_numbers = #tpu.dot_dimension_numbers<[1], [0], [0], [1], [0, 0, 1, 1], [], []>} : vector<64x64xf32>, vector<64x32xf32>, vector<64x32xf32> -> vector<64x32xf32>
    %c0_10 = arith.constant 0 : index
    %c0_11 = arith.constant 0 : index
    %15 = vector.load %arg2[%c0_10, %c0_11] : memref<32x96xf32, #tpu.memory_space<vmem>>, vector<32x96xf32>
    %cst_12 = arith.constant dense<0.000000e+00> : vector<64x96xf32>
    %16 = tpu.matmul %14, %15, %cst_12 {dimension_numbers = #tpu.dot_dimension_numbers<[1], [0], [0], [1], [0, 0, 1, 1], [], []>} : vector<64x32xf32>, vector<32x96xf32>, vector<64x96xf32> -> vector<64x96xf32>
    %17 = vector.extract_strided_slice %0 {offsets = [0, 0], sizes = [1, 96], strides = [1, 1]} : vector<10x128xf32> to vector<1x96xf32>
    %18 = vector.broadcast %17 : vector<1x96xf32> to vector<64x96xf32>
    %19 = arith.addf %16, %18 : vector<64x96xf32>
    %20 = vector.extract_strided_slice %19 {offsets = [0, 0], sizes = [64, 32], strides = [1, 1]} : vector<64x96xf32> to vector<64x32xf32>
    %21 = vector.extract_strided_slice %19 {offsets = [0, 32], sizes = [64, 32], strides = [1, 1]} : vector<64x96xf32> to vector<64x32xf32>
    %22 = vector.extract_strided_slice %19 {offsets = [0, 64], sizes = [64, 32], strides = [1, 1]} : vector<64x96xf32> to vector<64x32xf32>
    %cst_13 = arith.constant dense<0.000000e+00> : vector<64x64xf32>
    %23 = tpu.matmul %20, %21, %cst_13 {dimension_numbers = #tpu.dot_dimension_numbers<[1], [1], [0], [0], [0, 0, 1, 0], [], []>} : vector<64x32xf32>, vector<64x32xf32>, vector<64x64xf32> -> vector<64x64xf32>
    %cst_14 = arith.constant 0.176776692 : f32
    %24 = vector.broadcast %cst_14 : f32 to vector<64x64xf32>
    %25 = arith.mulf %23, %24 : vector<64x64xf32>
    %26 = arith.addf %25, %5 : vector<64x64xf32>
    %cst_15 = arith.constant dense<0xFF800000> : vector<64xf32>
    %27 = vector.multi_reduction <maximumf>, %26, %cst_15 [1] : vector<64x64xf32> to vector<64xf32>
    %28 = vector.shape_cast %27 : vector<64xf32> to vector<64x1xf32>
    %29 = vector.broadcast %28 : vector<64x1xf32> to vector<64x64xf32>
    %30 = arith.subf %26, %29 : vector<64x64xf32>
    %31 = math.exp %30 : vector<64x64xf32>
    %cst_16 = arith.constant dense<0.000000e+00> : vector<64xf32>
    %32 = vector.multi_reduction <add>, %31, %cst_16 [1] : vector<64x64xf32> to vector<64xf32>
    %33 = vector.shape_cast %32 : vector<64xf32> to vector<64x1xf32>
    %34 = tpu.reciprocal %33 {approx = true} : vector<64x1xf32> -> vector<64x1xf32>
    %35 = vector.broadcast %34 : vector<64x1xf32> to vector<64x64xf32>
    %36 = arith.mulf %31, %35 : vector<64x64xf32>
    %cst_17 = arith.constant dense<0.000000e+00> : vector<64x32xf32>
    %37 = tpu.matmul %36, %22, %cst_17 {dimension_numbers = #tpu.dot_dimension_numbers<[1], [0], [0], [1], [0, 0, 1, 1], [], []>} : vector<64x64xf32>, vector<64x32xf32>, vector<64x32xf32> -> vector<64x32xf32>
    %cst_18 = arith.constant dense<0.000000e+00> : vector<64x32xf32>
    %38 = tpu.matmul %37, %2, %cst_18 {dimension_numbers = #tpu.dot_dimension_numbers<[1], [0], [0], [1], [0, 0, 1, 1], [], []>} : vector<64x32xf32>, vector<32x32xf32>, vector<64x32xf32> -> vector<64x32xf32>
    %39 = vector.extract_strided_slice %0 {offsets = [1, 0], sizes = [1, 32], strides = [1, 1]} : vector<10x128xf32> to vector<1x32xf32>
    %40 = vector.broadcast %39 : vector<1x32xf32> to vector<64x32xf32>
    %41 = arith.addf %38, %40 : vector<64x32xf32>
    %42 = arith.addf %14, %41 : vector<64x32xf32>
    %43 = vector.extract_strided_slice %0 {offsets = [2, 0], sizes = [1, 32], strides = [1, 1]} : vector<10x128xf32> to vector<1x32xf32>
    %44 = vector.extract_strided_slice %0 {offsets = [3, 0], sizes = [1, 32], strides = [1, 1]} : vector<10x128xf32> to vector<1x32xf32>
    %cst_19 = arith.constant dense<0.000000e+00> : vector<64xf32>
    %45 = vector.multi_reduction <add>, %42, %cst_19 [1] : vector<64x32xf32> to vector<64xf32>
    %46 = vector.shape_cast %45 : vector<64xf32> to vector<64x1xf32>
    %cst_20 = arith.constant 3.200000e+01 : f32
    %47 = vector.broadcast %cst_20 : f32 to vector<64x1xf32>
    %48 = arith.divf %46, %47 : vector<64x1xf32>
    %49 = vector.broadcast %48 : vector<64x1xf32> to vector<64x32xf32>
    %50 = arith.subf %42, %49 : vector<64x32xf32>
    %51 = arith.mulf %50, %50 : vector<64x32xf32>
    %cst_21 = arith.constant dense<0.000000e+00> : vector<64xf32>
    %52 = vector.multi_reduction <add>, %51, %cst_21 [1] : vector<64x32xf32> to vector<64xf32>
    %53 = vector.shape_cast %52 : vector<64xf32> to vector<64x1xf32>
    %cst_22 = arith.constant 3.200000e+01 : f32
    %54 = vector.broadcast %cst_22 : f32 to vector<64x1xf32>
    %55 = arith.divf %53, %54 : vector<64x1xf32>
    %56 = vector.broadcast %48 : vector<64x1xf32> to vector<64x32xf32>
    %57 = arith.subf %42, %56 : vector<64x32xf32>
    %cst_23 = arith.constant 9.99999974E-6 : f32
    %58 = vector.broadcast %cst_23 : f32 to vector<64x1xf32>
    %59 = arith.addf %55, %58 : vector<64x1xf32>
    %60 = math.rsqrt %59 : vector<64x1xf32>
    %61 = vector.broadcast %60 : vector<64x1xf32> to vector<64x32xf32>
    %62 = arith.mulf %57, %61 : vector<64x32xf32>
    %63 = vector.broadcast %43 : vector<1x32xf32> to vector<64x32xf32>
    %64 = arith.mulf %62, %63 : vector<64x32xf32>
    %65 = vector.broadcast %44 : vector<1x32xf32> to vector<64x32xf32>
    %66 = arith.addf %64, %65 : vector<64x32xf32>
    %cst_24 = arith.constant dense<0.000000e+00> : vector<64x64xf32>
    %67 = tpu.matmul %66, %3, %cst_24 {dimension_numbers = #tpu.dot_dimension_numbers<[1], [0], [0], [1], [0, 0, 1, 1], [], []>} : vector<64x32xf32>, vector<32x64xf32>, vector<64x64xf32> -> vector<64x64xf32>
    %68 = vector.extract_strided_slice %0 {offsets = [4, 0], sizes = [1, 64], strides = [1, 1]} : vector<10x128xf32> to vector<1x64xf32>
    %69 = vector.broadcast %68 : vector<1x64xf32> to vector<64x64xf32>
    %70 = arith.addf %67, %69 : vector<64x64xf32>
    %71 = arith.mulf %70, %70 : vector<64x64xf32>
    %72 = arith.mulf %70, %71 : vector<64x64xf32>
    %cst_25 = arith.constant 4.471500e-02 : f32
    %73 = vector.broadcast %cst_25 : f32 to vector<64x64xf32>
    %74 = arith.mulf %73, %72 : vector<64x64xf32>
    %75 = arith.addf %70, %74 : vector<64x64xf32>
    %cst_26 = arith.constant 0.797884583 : f32
    %76 = vector.broadcast %cst_26 : f32 to vector<64x64xf32>
    %77 = arith.mulf %76, %75 : vector<64x64xf32>
    %78 = math.tanh %77 : vector<64x64xf32>
    %cst_27 = arith.constant 1.000000e+00 : f32
    %79 = vector.broadcast %cst_27 : f32 to vector<64x64xf32>
    %80 = arith.addf %79, %78 : vector<64x64xf32>
    %cst_28 = arith.constant 5.000000e-01 : f32
    %81 = vector.broadcast %cst_28 : f32 to vector<64x64xf32>
    %82 = arith.mulf %81, %80 : vector<64x64xf32>
    %83 = arith.mulf %70, %82 : vector<64x64xf32>
    %c0_29 = arith.constant 0 : index
    %c0_30 = arith.constant 0 : index
    %84 = vector.load %arg4[%c0_29, %c0_30] : memref<64x32xf32, #tpu.memory_space<vmem>>, vector<64x32xf32>
    %cst_31 = arith.constant dense<0.000000e+00> : vector<64x32xf32>
    %85 = tpu.matmul %83, %84, %cst_31 {dimension_numbers = #tpu.dot_dimension_numbers<[1], [0], [0], [1], [0, 0, 1, 1], [], []>} : vector<64x64xf32>, vector<64x32xf32>, vector<64x32xf32> -> vector<64x32xf32>
    %86 = vector.extract_strided_slice %0 {offsets = [5, 0], sizes = [1, 32], strides = [1, 1]} : vector<10x128xf32> to vector<1x32xf32>
    %87 = vector.broadcast %86 : vector<1x32xf32> to vector<64x32xf32>
    %88 = arith.addf %85, %87 : vector<64x32xf32>
    %89 = arith.addf %66, %88 : vector<64x32xf32>
    %90 = vector.extract_strided_slice %0 {offsets = [6, 0], sizes = [1, 32], strides = [1, 1]} : vector<10x128xf32> to vector<1x32xf32>
    %91 = vector.extract_strided_slice %0 {offsets = [7, 0], sizes = [1, 32], strides = [1, 1]} : vector<10x128xf32> to vector<1x32xf32>
    %cst_32 = arith.constant dense<0.000000e+00> : vector<64xf32>
    %92 = vector.multi_reduction <add>, %89, %cst_32 [1] : vector<64x32xf32> to vector<64xf32>
    %93 = vector.shape_cast %92 : vector<64xf32> to vector<64x1xf32>
    %cst_33 = arith.constant 3.200000e+01 : f32
    %94 = vector.broadcast %cst_33 : f32 to vector<64x1xf32>
    %95 = arith.divf %93, %94 : vector<64x1xf32>
    %96 = vector.broadcast %95 : vector<64x1xf32> to vector<64x32xf32>
    %97 = arith.subf %89, %96 : vector<64x32xf32>
    %98 = arith.mulf %97, %97 : vector<64x32xf32>
    %cst_34 = arith.constant dense<0.000000e+00> : vector<64xf32>
    %99 = vector.multi_reduction <add>, %98, %cst_34 [1] : vector<64x32xf32> to vector<64xf32>
    %100 = vector.shape_cast %99 : vector<64xf32> to vector<64x1xf32>
    %cst_35 = arith.constant 3.200000e+01 : f32
    %101 = vector.broadcast %cst_35 : f32 to vector<64x1xf32>
    %102 = arith.divf %100, %101 : vector<64x1xf32>
    %103 = vector.broadcast %95 : vector<64x1xf32> to vector<64x32xf32>
    %104 = arith.subf %89, %103 : vector<64x32xf32>
    %cst_36 = arith.constant 9.99999974E-6 : f32
    %105 = vector.broadcast %cst_36 : f32 to vector<64x1xf32>
    %106 = arith.addf %102, %105 : vector<64x1xf32>
    %107 = math.rsqrt %106 : vector<64x1xf32>
    %108 = vector.broadcast %107 : vector<64x1xf32> to vector<64x32xf32>
    %109 = arith.mulf %104, %108 : vector<64x32xf32>
    %110 = vector.broadcast %90 : vector<1x32xf32> to vector<64x32xf32>
    %111 = arith.mulf %109, %110 : vector<64x32xf32>
    %112 = vector.broadcast %91 : vector<1x32xf32> to vector<64x32xf32>
    %113 = arith.addf %111, %112 : vector<64x32xf32>
    %cst_37 = arith.constant dense<0.000000e+00> : vector<8x32xf32>
    %114 = tpu.matmul %6, %113, %cst_37 {dimension_numbers = #tpu.dot_dimension_numbers<[1], [0], [0], [1], [0, 0, 1, 1], [], []>} : vector<8x64xf32>, vector<64x32xf32>, vector<8x32xf32> -> vector<8x32xf32>
    %cst_38 = arith.constant dense<0.000000e+00> : vector<8x32xf32>
    %115 = tpu.matmul %114, %4, %cst_38 {dimension_numbers = #tpu.dot_dimension_numbers<[1], [0], [0], [1], [0, 0, 1, 1], [], []>} : vector<8x32xf32>, vector<32x32xf32>, vector<8x32xf32> -> vector<8x32xf32>
    %116 = vector.extract_strided_slice %0 {offsets = [8, 0], sizes = [1, 32], strides = [1, 1]} : vector<10x128xf32> to vector<1x32xf32>
    %117 = vector.broadcast %116 : vector<1x32xf32> to vector<8x32xf32>
    %118 = arith.addf %115, %117 : vector<8x32xf32>
    %119 = math.tanh %118 : vector<8x32xf32>
    %120 = vector.extract_strided_slice %119 {offsets = [0, 0], sizes = [2, 32], strides = [1, 1]} : vector<8x32xf32> to vector<2x32xf32>
    %121 = vector.extract_strided_slice %119 {offsets = [2, 0], sizes = [2, 32], strides = [1, 1]} : vector<8x32xf32> to vector<2x32xf32>
    %122 = vector.extract_strided_slice %119 {offsets = [4, 0], sizes = [2, 32], strides = [1, 1]} : vector<8x32xf32> to vector<2x32xf32>
    %123 = vector.extract_strided_slice %119 {offsets = [6, 0], sizes = [2, 32], strides = [1, 1]} : vector<8x32xf32> to vector<2x32xf32>
    %124 = tpu.concatenate %120, %121, %122, %123 in 1 : vector<2x32xf32>, vector<2x32xf32>, vector<2x32xf32>, vector<2x32xf32> -> vector<2x128xf32>
    %c0_39 = arith.constant 0 : index
    %c0_40 = arith.constant 0 : index
    %125 = vector.load %arg7[%c0_39, %c0_40] : memref<128x3xf32, #tpu.memory_space<vmem>>, vector<128x3xf32>
    %cst_41 = arith.constant dense<0.000000e+00> : vector<2x3xf32>
    %126 = tpu.matmul %124, %125, %cst_41 {dimension_numbers = #tpu.dot_dimension_numbers<[1], [0], [0], [1], [0, 0, 1, 1], [], []>} : vector<2x128xf32>, vector<128x3xf32>, vector<2x3xf32> -> vector<2x3xf32>
    %127 = vector.extract_strided_slice %0 {offsets = [9, 0], sizes = [1, 3], strides = [1, 1]} : vector<10x128xf32> to vector<1x3xf32>
    %128 = vector.broadcast %127 : vector<1x3xf32> to vector<2x3xf32>
    %129 = arith.addf %126, %128 : vector<2x3xf32>
    %c0_42 = arith.constant 0 : index
    %c0_43 = arith.constant 0 : index
    %130 = vector.load %arg8[%c0_42, %c0_43] : memref<2x3xf32, #tpu.memory_space<vmem>>, vector<2x3xf32>
    tpu.vector_store %arg8[%c0_42, %c0_43], %129 {strides = array<i32>} : memref<2x3xf32, #tpu.memory_space<vmem>>, vector<2x3xf32>,
    return
  }
}

</mosaic_0001>

<bundles_post_ra>
// kernel: model_forward.1
= control target key start
LH: loop header
LB: loop body
LE: loop exit
PB: predicated region body
PF: predicated region fallthrough
CT: control target
= control target key end

     0   :  { %v2608_v2 = vmov 0   ;;  %s3317_s0 = inlined_call_operand.vmem [shape: s32[64,1], index: 0, kind: input, shape index: {}]   ;;  %s3318_s1 = inlined_call_operand.vmem [shape: f32[64,32], index: 1, kind: input, shape index: {}]   ;;  %s3319_s2 = inlined_call_operand.vmem [shape: f32[32,96], index: 2, kind: input, shape index: {}]   ;;  %s3320_s3 = inlined_call_operand.vmem [shape: f32[32,128], index: 3, kind: input, shape index: {}]   ;;  %s3321_s4 = inlined_call_operand.vmem [shape: f32[64,32], index: 4, kind: input, shape index: {}]   ;;  %s3322_s5 = inlined_call_operand.vmem [shape: f32[10,128], index: 5, kind: input, shape index: {}]   ;;  %s3323_s6 = inlined_call_operand.vmem [shape: f32[72,64], index: 6, kind: input, shape index: {}]   ;;  %s3324_s7 = inlined_call_operand.vmem [shape: f32[128,3], index: 7, kind: input, shape index: {}]   ;;  %s3325_s8 = inlined_call_operand.hbm [shape: f32[2,3], index: 8, kind: output, shape index: {}]  }
   0x1   :  { %v47_v0 = vld [vmem:[%s3317_s0 + $0x10] sm:$0xff]  ;;  %v45_v1 = vld [vmem:[%s3317_s0] sm:$0xff]  ;;  %2440 = vset.pattern.permute.xlu1 %v2608_v2  ;;  %2439 = vset.pattern.permute.xlu0 %v2608_v2  ;;  %v48_v3 = vld [vmem:[%s3317_s0 + $0x18] sm:$0xff] }
   0x2   :  { %62 = vperm.xlu1 %2440, %v47_v0   ;;  %56 = vperm.xlu0 %2439, %v45_v1   ;;  %v46_v4 = vld [vmem:[%s3317_s0 + $0x8] sm:$0xff]  ;;  %v103_v5 = vld [vmem:[%s3318_s1] sm:$0xff]  ;;  %v105_v7 = vld [vmem:[%s3318_s1 + $0x10] sm:$0xff] }
   0x3   :  { %v104_v6 = vld [vmem:[%s3318_s1 + $0x8] sm:$0xff]  ;;  %v106_v8 = vld [vmem:[%s3318_s1 + $0x18] sm:$0xff] }
   0x4   :  { %v2293_v9 = vpack.c.bf16 %v104_v6, %v103_v5  ;;  %v2297_v10 = vpack.c.bf16 %v106_v8, %v105_v7 }
   0x5   :  { %13 = vsyncpa [#allocation3], 0  ;;  %v107_v11 = vld [vmem:[%s3318_s1 + $0x20] sm:$0xff]  ;;  %v108_v12 = vld [vmem:[%s3318_s1 + $0x28] sm:$0xff]  ;;  %v53_v27 = vlaneseq  ;;  %vm111_vm0 = vcmask 523264   ;;  %v2609_v31 = vmov 0.0  }
   0x6   :  { %65 = vperm.xlu1 %2440, %v48_v3   ;;  %59 = vperm.xlu0 %2439, %v46_v4   ;;  %v50_v13 = vld [vmem:[%s3317_s0 + $0x28] sm:$0xff]  ;;  %v49_v14 = vld [vmem:[%s3317_s0 + $0x20] sm:$0xff]  ;;  %v2301_v15 = vpack.c.bf16 %v108_v12, %v107_v11  ;;  %v109_v16 = vld [vmem:[%s3318_s1 + $0x30] sm:$0xff]  ;;  %vm249_vm9 = vcmask 261120   ;;  %s2610_s22 = smov 96   ;;  %vm2613_vm11 = vmmov 0  }
   0x7   :  { %2294 = vmatprep.subr.bf16.mxu0 %v2293_v9  ;;  %v110_v17 = vld [vmem:[%s3318_s1 + $0x38] sm:$0xff]  ;;  %v51_v19 = vld [vmem:[%s3317_s0 + $0x30] sm:$0xff]  ;;  %v241_v21 = vld [vmem:[%s3319_s2] sm:$0xff]  ;;  %v54_v28 = vand.u32 127, %v53_v27  ;;  %v2769_v54 = vshrl.u32 %v53_v27, 7  ;;  %s2611_s1 = smov 64  }
   0x8   :  { %2296 = vmatpush3.bf16.msra.mxu0 %v2293_v9  ;;  %v52_v18 = vld [vmem:[%s3317_s0 + $0x38] sm:$0xff]  ;;  %v2305_v20 = vpack.c.bf16 %v110_v17, %v109_v16  ;;  %v242_v22 = vld [vmem:[%s3319_s2 + $0x8] sm:$0xff]  ;;  %v243_v23 = vld [vmem:[%s3319_s2 + $0x10] sm:$0xff]  ;;  %s2614_s18 = smov 32   ;;  %vm1743_vm12 = vcmask 785408   ;;  %vm1835_vm13 = vcmask 17408  }
   0x9   :  { %2298 = vmatprep.subr.bf16.mxu0 %v2297_v10  ;;  %v2309_v24 = vpack.c.bf16 %v242_v22, %v241_v21  ;;  %v244_v25 = vld [vmem:[%s3319_s2 + $0x18] sm:$0xff]  ;;  %v247_v55 = vsub.s32 0, %v2769_v54  ;;  %v2775_v56 = vld [vmem:[%s3322_s5] sm:$0xff]  ;;  %vm2799_vm10 = vmpackc.low %vm249_vm9, %vm249_vm9 }
   0xa   :  { %71 = vperm.xlu1 %2440, %v50_v13   ;;  %68 = vperm.xlu0 %2439, %v49_v14   ;;  %v2313_v26 = vpack.c.bf16 %v244_v25, %v243_v23  ;;  %v43_v17 = vld [vmem:[%s3323_s6 + $0x38] sm:$0xff] }
   0xb   :  { %2310 = vmatprep.subr.bf16.mxu1 %v2309_v24  ;;  %v248_v57 = vrot.slane %v2775_v56, %v247_v55 }
   0xc   :  { %2300 = vmatpush3.bf16.msra.mxu0 %v2297_v10  ;;  %2312 = vmatpush3.bf16.msra.mxu1 %v2309_v24 }
   0xd   :  { %2302 = vmatprep.subr.bf16.mxu0 %v2301_v15  ;;  %2314 = vmatprep.subr.bf16.mxu1 %v2313_v26 }
   0xe   :  { %77 = vperm.xlu1 %2440, %v52_v18   ;;  %74 = vperm.xlu0 %2439, %v51_v19  }
  0x10   :  { %2304 = vmatpush3.bf16.msra.mxu0 %v2301_v15  ;;  %2316 = vmatpush3.bf16.msra.mxu1 %v2313_v26 }
  0x11   :  { %2306 = vmatprep.subr.bf16.mxu0 %v2305_v20 }
  0x14   :  { %2308 = vmatpush3.bf16.msra.mxu0 %v2305_v20 }
  0x81   :  { %v63_v29 = vpop.permute.xlu1 %62  ;;  %v57_v30 = vpop.permute.xlu0 %56 }
  0x82   :  { %vm79_vm1 = vcmp.eq.s32.totalorder %v54_v28, %v57_v30  ;;  %vm81_vm2 = vcmp.eq.s32.totalorder %v54_v28, %v63_v29 }
  0x83   :  { %v1851_v32 = vsel %vm79_vm1, 1.0, %v2609_v31  ;;  %v1853_v35 = vsel %vm81_vm2, 1.0, %v2609_v31 }
  0x84   :  { %2072 = vmatprep.mubr.msk.f32.mxu0 %vm111_vm0, %v1851_v32 }
  0x85   :  { %v66_v33 = vpop.permute.xlu1 %65  ;;  %v60_v34 = vpop.permute.xlu0 %59 }
  0x86   :  { %vm82_vm3 = vcmp.eq.s32.totalorder %v54_v28, %v66_v33  ;;  %vm80_vm4 = vcmp.eq.s32.totalorder %v54_v28, %v60_v34  ;;  %v37_v33 = vld [vmem:[%s3323_s6 + $0x8] sm:$0xff] }
  0x87   :  { %v1852_v36 = vsel %vm80_vm4, 1.0, %v2609_v31  ;;  %v1854_v37 = vsel %vm82_vm3, 1.0, %v2609_v31 }
  0x88   :  { %2073 = vmatmul.mubr.msk.f32.vlgmr.msra.gmra.mrb[0].mxu0 %vm111_vm0, %v1852_v36  ;;  %v36_v36 = vld [vmem:[%s3323_s6] sm:$0xff] }
  0x89   :  { %v72_v38 = vpop.permute.xlu1 %71  ;;  %v69_v39 = vpop.permute.xlu0 %68  ;;  %2075 = vmatprep.mubr.msk.f32.mxu0 %vm111_vm0, %v1853_v35 }
  0x8a   :  { %vm83_vm5 = vcmp.eq.s32.totalorder %v54_v28, %v69_v39  ;;  %vm84_vm6 = vcmp.eq.s32.totalorder %v54_v28, %v72_v38 }
  0x8b   :  { %v1855_v40 = vsel %vm83_vm5, 1.0, %v2609_v31  ;;  %v1856_v43 = vsel %vm84_vm6, 1.0, %v2609_v31 }
  0x8c   :  { %2076 = vmatmul.mubr.msk.f32.gmra.mrb[2].mxu0 %vm111_vm0, %v1854_v37 }
  0x8d   :  { %v78_v41 = vpop.permute.xlu1 %77  ;;  %2078 = vmatprep.mubr.msk.f32.mxu0 %vm111_vm0, %v1855_v40  ;;  %v75_v42 = vpop.permute.xlu0 %74 }
  0x8e   :  { %vm85_vm7 = vcmp.eq.s32.totalorder %v54_v28, %v75_v42  ;;  %vm86_vm8 = vcmp.eq.s32.totalorder %v54_v28, %v78_v41 }
  0x8f   :  { %v1857_v44 = vsel %vm85_vm7, 1.0, %v2609_v31  ;;  %v1858_v45 = vsel %vm86_vm8, 1.0, %v2609_v31 }
  0x90   :  { %2079 = vmatmul.mubr.msk.f32.gmra.mrb[4].mxu0 %vm111_vm0, %v1856_v43 }
  0x91   :  { %2081 = vmatprep.mubr.msk.f32.mxu0 %vm111_vm0, %v1857_v44  ;;  %v38_v44 = vld [vmem:[%s3323_s6 + $0x10] sm:$0xff] }
  0x94   :  { %2082 = vmatmul.mubr.msk.f32.gmra.mrb[6].mxu0 %vm111_vm0, %v1858_v45 }
 0x15b   :  { %v2737_v46 = vpop.f32.mrb[0].mxu0 }
 0x15c   :  { %v2739_v47 = vpop.f32.mrb[1].mxu0 }
 0x15d   :  { %2092 = vmatprep.mubr.msk.f32.mxu1 %vm249_vm9, %v2739_v47 }
 0x15e   :  { %2093 = vmatmul.mubr.msk.f32.vlgmr.msra.gmra.mrb[0].mxu1 %vm249_vm9, %v2737_v46 }
 0x15f   :  { %v2745_v48 = vpop.f32.mrb[2].mxu0 }
 0x160   :  { %v2747_v49 = vpop.f32.mrb[3].mxu0 }
 0x161   :  { %2095 = vmatprep.mubr.msk.f32.mxu1 %vm249_vm9, %v2747_v49 }
 0x162   :  { %2096 = vmatmul.mubr.msk.f32.gmra.mrb[2].mxu1 %vm249_vm9, %v2745_v48 }
 0x163   :  { %v2753_v50 = vpop.f32.mrb[4].mxu0 }
 0x164   :  { %v2755_v51 = vpop.f32.mrb[5].mxu0 }
 0x165   :  { %2098 = vmatprep.mubr.msk.f32.mxu1 %vm249_vm9, %v2755_v51 }
 0x166   :  { %2099 = vmatmul.mubr.msk.f32.gmra.mrb[4].mxu1 %vm249_vm9, %v2753_v50 }
 0x167   :  { %v2761_v52 = vpop.f32.mrb[6].mxu0 }
 0x168   :  { %v2763_v53 = vpop.f32.mrb[7].mxu0 }
 0x169   :  { %2101 = vmatprep.mubr.msk.f32.mxu1 %vm249_vm9, %v2763_v53 }
 0x16a   :  { %2102 = vmatmul.mubr.msk.f32.gmra.mrb[6].mxu1 %vm249_vm9, %v2761_v52 }
 0x231   :  { %v2094_v58 = vpop.f32.mrb[0].mxu1 }
 0x232   :  { %v346_v59 = vadd.f32 %v2094_v58, %v248_v57  ;;  %v340_v60 = vpop.f32.mrb[1].mxu1  ;;  %v39_v58 = vld [vmem:[%s3323_s6 + $0x18] sm:$0xff] }
 0x233   :  { %v341_v61 = vadd.f32 %v340_v60, %v248_v57 }
 0x235   :  { %v2097_v62 = vpop.f32.mrb[2].mxu1  ;;  %2120 = vmatprep.mubr.msk.f32.mxu1 %vm249_vm9, %v341_v61  ;;  %v2781_v63 = vpack.i.bf16 %v346_v59, %v341_v61 }
 0x236   :  { %v356_v0 = vadd.f32 %v2097_v62, %v248_v57  ;;  %v350_v1 = vpop.f32.mrb[3].mxu1 }
 0x237   :  { %v351_v2 = vadd.f32 %v350_v1, %v248_v57  ;;  %2442 = vrot.lane.b32.xlu0 %v2781_v63, %s2610_s22 }
 0x239   :  { %v2100_v3 = vpop.f32.mrb[4].mxu1  ;;  %v2785_v4 = vpack.i.bf16 %v356_v0, %v351_v2 }
 0x23a   :  { %v366_v5 = vadd.f32 %v2100_v3, %v248_v57  ;;  %v360_v6 = vpop.f32.mrb[5].mxu1 }
 0x23b   :  { %v361_v7 = vadd.f32 %v360_v6, %v248_v57  ;;  %2447 = vrot.lane.b32.xlu1 %v2785_v4, %s2610_s22 }
 0x23d   :  { %v2103_v8 = vpop.f32.mrb[6].mxu1  ;;  %v2789_v9 = vpack.i.bf16 %v366_v5, %v361_v7 }
 0x23e   :  { %v376_v10 = vadd.f32 %v2103_v8, %v248_v57  ;;  %v370_v11 = vpop.f32.mrb[7].mxu1 }
 0x23f   :  { %v371_v12 = vadd.f32 %v370_v11, %v248_v57  ;;  %2452 = vrot.lane.b32.xlu0 %v2789_v9, %s2610_s22  ;;  %v42_v11 = vld [vmem:[%s3323_s6 + $0x30] sm:$0xff] }
 0x241   :  { %v2793_v13 = vpack.i.bf16 %v376_v10, %v371_v12 }
 0x243   :  { %2457 = vrot.lane.b32.xlu1 %v2793_v13, %s2610_s22 }
 0x2a9   :  { %v2443_v14 = vpop.permute.xlu0 %2442 }
 0x2aa   :  { %v2445_v15 = vunpack.i.h.bf16 %v2443_v14  ;;  %v2444_v16 = vunpack.i.l.bf16 %v2443_v14 }
 0x2ac   :  { %v2317_v18 = vpack.c.bf16 %v2445_v15, %v2444_v16 }
 0x2ad   :  { %v2448_v19 = vpop.permute.xlu1 %2447 }
 0x2ae   :  { %v2450_v20 = vunpack.i.h.bf16 %v2448_v19  ;;  %v2449_v21 = vunpack.i.l.bf16 %v2448_v19  ;;  %2319 = vmatprep.subr.msk.bf16.mxu1 %vm2799_vm10, %v2317_v18 }
 0x2af   :  { %2322 = vmatpush3.bf16.xpose.msk.msra.mxu1 %vm2799_vm10, %v2317_v18 }
 0x2b0   :  { %v2323_v22 = vpack.c.bf16 %v2450_v20, %v2449_v21 }
 0x2b1   :  { %v2453_v23 = vpop.permute.xlu0 %2452 }
 0x2b2   :  { %v2455_v24 = vunpack.i.h.bf16 %v2453_v23  ;;  %v2454_v25 = vunpack.i.l.bf16 %v2453_v23  ;;  %2325 = vmatprep.subr.msk.bf16.mxu1 %vm2799_vm10, %v2323_v22 }
 0x2b4   :  { %v2329_v26 = vpack.c.bf16 %v2455_v24, %v2454_v25 }
 0x2b5   :  { %v2458_v27 = vpop.permute.xlu1 %2457 }
 0x2b6   :  { %v2460_v28 = vunpack.i.h.bf16 %v2458_v27  ;;  %v2459_v29 = vunpack.i.l.bf16 %v2458_v27 }
 0x2b7   :  { %2328 = vmatpush3.bf16.xpose.msk.msra.mxu1 %vm2799_vm10, %v2323_v22 }
 0x2b8   :  { %2331 = vmatprep.subr.msk.bf16.mxu1 %vm2799_vm10, %v2329_v26  ;;  %v2335_v30 = vpack.c.bf16 %v2460_v28, %v2459_v29 }
 0x2bf   :  { %2334 = vmatpush3.bf16.xpose.msk.msra.mxu1 %vm2799_vm10, %v2329_v26 }
 0x2c0   :  { %2337 = vmatprep.subr.msk.bf16.mxu1 %vm2799_vm10, %v2335_v30 }
 0x2c7   :  { %2340 = vmatpush3.bf16.xpose.msk.msra.mxu1 %vm2799_vm10, %v2335_v30 }
 0x2ce   :  { %2121 = vmatmul.mubr.msk.f32.vlgmr.msra.gmra.mrb[8].mxu1 %vm249_vm9, %v346_v59 }
 0x2cf   :  { %2123 = vmatprep.mubr.msk.f32.mxu1 %vm249_vm9, %v351_v2 }
 0x2d2   :  { %2124 = vmatmul.mubr.msk.f32.gmra.mrb[10].mxu1 %vm249_vm9, %v356_v0  ;;  %v40_v0 = vld [vmem:[%s3323_s6 + $0x20] sm:$0xff] }
 0x2d3   :  { %2126 = vmatprep.mubr.msk.f32.mxu1 %vm249_vm9, %v361_v7 }
 0x2d6   :  { %2127 = vmatmul.mubr.msk.f32.gmra.mrb[12].mxu1 %vm249_vm9, %v366_v5  ;;  %v41_v5 = vld [vmem:[%s3323_s6 + $0x28] sm:$0xff] }
 0x2d7   :  { %2129 = vmatprep.mubr.msk.f32.mxu1 %vm249_vm9, %v371_v12 }
 0x2da   :  { %2130 = vmatmul.mubr.msk.f32.gmra.mrb[14].mxu1 %vm249_vm9, %v376_v10 }
 0x3a1   :  { %v2122_v32 = vpop.f32.mrb[8].mxu1 }
 0x3a2   :  { %v541_v34 = vmul.f32 0.17677669, %v2122_v32  ;;  %v501_v35 = vpop.f32.mrb[9].mxu1 }
 0x3a3   :  { %v540_v37 = vmul.f32 0.17677669, %v501_v35 }
 0x3a4   :  { %v549_v38 = vadd.f32 %v541_v34, %v37_v33 }
 0x3a5   :  { %v2125_v39 = vpop.f32.mrb[10].mxu1  ;;  %v548_v40 = vadd.f32 %v540_v37, %v36_v36 }
 0x3a6   :  { %v543_v41 = vmul.f32 0.17677669, %v2125_v39  ;;  %v511_v42 = vpop.f32.mrb[11].mxu1  ;;  %v559_v43 = vsel %vm111_vm0, %v549_v38, -inf }
 0x3a7   :  { %v542_v45 = vmul.f32 0.17677669, %v511_v42  ;;  %560 = vmax.xlane.f32.xlu1 %v559_v43  ;;  %v556_v57 = vsel %vm111_vm0, %v548_v40, -inf }
 0x3a8   :  { %557 = vmax.xlane.f32.xlu0 %v556_v57  ;;  %v551_v62 = vadd.f32 %v543_v41, %v39_v58 }
 0x3a9   :  { %v2128_v59 = vpop.f32.mrb[12].mxu1  ;;  %v550_v60 = vadd.f32 %v542_v45, %v38_v44 }
 0x3aa   :  { %v521_v61 = vpop.f32.mrb[13].mxu1  ;;  %v545_v1 = vmul.f32 0.17677669, %v2128_v59  ;;  %v565_v10 = vsel %vm111_vm0, %v551_v62, -inf }
 0x3ab   :  { %v544_v2 = vmul.f32 0.17677669, %v521_v61  ;;  %v562_v3 = vsel %vm111_vm0, %v550_v60, -inf }
 0x3ac   :  { %563 = vmax.xlane.f32.xlu0 %v562_v3  ;;  %v553_v16 = vadd.f32 %v545_v1, %v41_v5 }
 0x3ad   :  { %v2131_v6 = vpop.f32.mrb[14].mxu1  ;;  %v552_v7 = vadd.f32 %v544_v2, %v40_v0 }
 0x3ae   :  { %v531_v8 = vpop.f32.mrb[15].mxu1  ;;  %v547_v12 = vmul.f32 0.17677669, %v2131_v6  ;;  %v571_v19 = vsel %vm111_vm0, %v553_v16, -inf }
 0x3af   :  { %v546_v14 = vmul.f32 0.17677669, %v531_v8  ;;  %v568_v15 = vsel %vm111_vm0, %v552_v7, -inf }
 0x3b0   :  { %566 = vmax.xlane.f32.xlu0 %v565_v10  ;;  %569 = vmax.xlane.f32.xlu1 %v568_v15  ;;  %v555_v21 = vadd.f32 %v547_v12, %v43_v17 }
 0x3b1   :  { %v554_v18 = vadd.f32 %v546_v14, %v42_v11 }
 0x3b2   :  { %v577_v22 = vsel %vm111_vm0, %v555_v21, -inf }
 0x3b3   :  { %v574_v20 = vsel %vm111_vm0, %v554_v18, -inf }
 0x3b4   :  { %572 = vmax.xlane.f32.xlu0 %v571_v19  ;;  %575 = vmax.xlane.f32.xlu1 %v574_v20 }
 0x3b8   :  { %578 = vmax.xlane.f32.xlu0 %v577_v22 }
 0x3c5   :  { %2462 = vrot.lane.b32.xlu1 %v2781_v63, %s2611_s1 }
 0x434   :  { %v561_v23 = vpop.xlane.xlu1 %560 }
 0x435   :  { %v581_v24 = vsub.f32 %v549_v38, %v561_v23  ;;  %v558_v25 = vpop.xlane.xlu0 %557 }
 0x436   :  { %v580_v26 = vsub.f32 %v548_v40, %v558_v25 }
 0x437   :  { %v590_v27 = vmul.f32 1.442695, %v581_v24 }
 0x438   :  { %v588_v28 = vmul.f32 1.442695, %v580_v26 }
 0x439   :  { %2501 = vpow2.f32 %v590_v27  ;;  %v564_v29 = vpop.xlane.xlu0 %563 }
 0x43a   :  { %2503 = vpow2.f32 %v588_v28  ;;  %v582_v30 = vsub.f32 %v550_v60, %v564_v29 }
 0x43c   :  { %v592_v32 = vmul.f32 1.442695, %v582_v30 }
 0x43d   :  { %v567_v33 = vpop.xlane.xlu0 %566  ;;  %v570_v34 = vpop.xlane.xlu1 %569 }
 0x43e   :  { %2505 = vpow2.f32 %v592_v32  ;;  %v583_v35 = vsub.f32 %v551_v62, %v567_v33  ;;  %v584_v36 = vsub.f32 %v552_v7, %v570_v34 }
 0x440   :  { %v594_v37 = vmul.f32 1.442695, %v583_v35  ;;  %v596_v39 = vmul.f32 1.442695, %v584_v36 }
 0x441   :  { %v573_v41 = vpop.xlane.xlu0 %572  ;;  %v576_v63 = vpop.xlane.xlu1 %575 }
 0x442   :  { %2507 = vpow2.f32 %v594_v37  ;;  %v585_v38 = vsub.f32 %v553_v16, %v573_v41  ;;  %v586_v44 = vsub.f32 %v554_v18, %v576_v63  ;;  %v2899_v37 = vld [vmem:[%s3320_s3] sm:$0xff] }
 0x443   :  { %v2860_v42 = vpop.eup %2501  ;;  %2509 = vpow2.f32 %v596_v39  ;;  %v2904_v39 = vld [vmem:[%s3320_s3 + $0x8] sm:$0xff] }
 0x444   :  { %v2504_v40 = vpop.eup %2503  ;;  %v598_v43 = vmul.f32 1.442695, %v585_v38  ;;  %v607_v45 = vsel %vm111_vm0, %v2860_v42, 0.0  ;;  %v600_v1 = vmul.f32 1.442695, %v586_v44  ;;  %v2357_v63 = vpack.c.bf16 %v2904_v39, %v2899_v37 }
 0x445   :  { %608 = vadd.xlane.f32.xlu0 %v607_v45  ;;  %v579_v57 = vpop.xlane.xlu0 %578  ;;  %v2463_v58 = vpop.permute.xlu1 %2462  ;;  %v604_v59 = vsel %vm111_vm0, %v2504_v40, 0.0 }
 0x446   :  { %2511 = vpow2.f32 %v598_v43  ;;  %v587_v60 = vsub.f32 %v555_v21, %v579_v57  ;;  %v2465_v61 = vunpack.i.h.bf16 %v2463_v58  ;;  %v2464_v62 = vunpack.i.l.bf16 %v2463_v58  ;;  %605 = vadd.xlane.f32.xlu1 %v604_v59  ;;  %v2916_v43 = vld [vmem:[%s3320_s3 + $0x18] sm:$0xff] }
 0x448   :  { %v2865_v0 = vpop.eup %2505  ;;  %v602_v2 = vmul.f32 1.442695, %v587_v60  ;;  %v2341_v3 = vpack.c.bf16 %v2465_v61, %v2464_v62 }
 0x449   :  { %v610_v5 = vsel %vm111_vm0, %v2865_v0, 0.0 }
 0x44a   :  { %2513 = vpow2.f32 %v602_v2  ;;  %611 = vadd.xlane.f32.xlu1 %v610_v5  ;;  %2342 = vmatprep.subr.bf16.mxu0 %v2341_v3 }
 0x44b   :  { %2344 = vmatpush3.bf16.msra.mxu0 %v2341_v3  ;;  %2515 = vpow2.f32 %v600_v1 }
 0x44c   :  { %v2869_v6 = vpop.eup %2507 }
 0x44d   :  { %v2871_v7 = vpop.eup %2509  ;;  %v613_v8 = vsel %vm111_vm0, %v2869_v6, 0.0 }
 0x44e   :  { %614 = vadd.xlane.f32.xlu0 %v613_v8  ;;  %v616_v10 = vsel %vm111_vm0, %v2871_v7, 0.0 }
 0x44f   :  { %617 = vadd.xlane.f32.xlu1 %v616_v10 }
 0x450   :  { %v2877_v11 = vpop.eup %2511 }
 0x451   :  { %v619_v12 = vsel %vm111_vm0, %v2877_v11, 0.0 }
 0x452   :  { %620 = vadd.xlane.f32.xlu0 %v619_v12 }
 0x454   :  { %v2881_v14 = vpop.eup %2513 }
 0x455   :  { %v625_v15 = vsel %vm111_vm0, %v2881_v14, 0.0  ;;  %v2885_v16 = vpop.eup %2515 }
 0x456   :  { %626 = vadd.xlane.f32.xlu0 %v625_v15  ;;  %v622_v17 = vsel %vm111_vm0, %v2885_v16, 0.0 }
 0x45a   :  { %623 = vadd.xlane.f32.xlu0 %v622_v17 }
 0x460   :  { %2472 = vrot.lane.b32.xlu1 %v2789_v9, %s2611_s1 }
 0x464   :  { %2477 = vrot.lane.b32.xlu1 %v2793_v13, %s2611_s1 }
 0x470   :  { %2467 = vrot.lane.b32.xlu0 %v2785_v4, %s2611_s1 }
 0x4d2   :  { %v609_v19 = vpop.xlane.xlu0 %608 }
 0x4d3   :  { %v606_v18 = vpop.xlane.xlu1 %605 }
 0x4d4   :  { %2517 = vrcp.f32 %v606_v18 }
 0x4d5   :  { %2519 = vrcp.f32 %v609_v19 }
 0x4d7   :  { %v612_v20 = vpop.xlane.xlu1 %611 }
 0x4d8   :  { %2521 = vrcp.f32 %v612_v20 }
 0x4db   :  { %v615_v21 = vpop.xlane.xlu0 %614 }
 0x4dc   :  { %v618_v25 = vpop.xlane.xlu1 %617  ;;  %2523 = vrcp.f32 %v615_v21 }
 0x4dd   :  { %2525 = vrcp.f32 %v618_v25 }
 0x4de   :  { %v2518_v22 = vpop.eup %2517 }
 0x4df   :  { %v621_v23 = vpop.xlane.xlu0 %620  ;;  %v636_v24 = vmul.f32 %v2518_v22, %v2504_v40  ;;  %v2520_v38 = vpop.eup %2519  ;;  %v2911_v40 = vld [vmem:[%s3320_s3 + $0x10] sm:$0xff] }
 0x4e0   :  { %v2473_v27 = vpop.permute.xlu1 %2472  ;;  %2527 = vrcp.f32 %v621_v23  ;;  %v637_v45 = vmul.f32 %v2520_v38, %v2860_v42  ;;  %v2361_v57 = vpack.c.bf16 %v2916_v43, %v2911_v40 }
 0x4e1   :  { %2148 = vmatprep.mubr.msk.f32.mxu0 %vm111_vm0, %v636_v24  ;;  %v2475_v29 = vunpack.i.h.bf16 %v2473_v27  ;;  %v2474_v13 = vunpack.i.l.bf16 %v2473_v27 }
 0x4e2   :  { %v2522_v44 = vpop.eup %2521 }
 0x4e3   :  { %v627_v26 = vpop.xlane.xlu0 %626  ;;  %v2349_v34 = vpack.c.bf16 %v2475_v29, %v2474_v13  ;;  %v638_v59 = vmul.f32 %v2522_v44, %v2865_v0 }
 0x4e4   :  { %v2478_v4 = vpop.permute.xlu1 %2477 }
 0x4e5   :  { %v2480_v35 = vunpack.i.h.bf16 %v2478_v4  ;;  %v2479_v36 = vunpack.i.l.bf16 %v2478_v4 }
 0x4e6   :  { %v2524_v58 = vpop.eup %2523 }
 0x4e7   :  { %v624_v9 = vpop.xlane.xlu0 %623  ;;  %v2353_v41 = vpack.c.bf16 %v2480_v35, %v2479_v36  ;;  %v2526_v60 = vpop.eup %2525  ;;  %v639_v61 = vmul.f32 %v2524_v58, %v2869_v6 }
 0x4e8   :  { %2529 = vrcp.f32 %v624_v9  ;;  %v640_v1 = vmul.f32 %v2526_v60, %v2871_v7 }
 0x4e9   :  { %2531 = vrcp.f32 %v627_v26 }
 0x4ea   :  { %v2528_v62 = vpop.eup %2527 }
 0x4eb   :  { %v2468_v28 = vpop.permute.xlu0 %2467  ;;  %v641_v0 = vmul.f32 %v2528_v62, %v2877_v11 }
 0x4ec   :  { %v2470_v30 = vunpack.i.h.bf16 %v2468_v28  ;;  %v2469_v32 = vunpack.i.l.bf16 %v2468_v28 }
 0x4ee   :  { %v2345_v33 = vpack.c.bf16 %v2470_v30, %v2469_v32 }
 0x4f0   :  { %2346 = vmatprep.subr.bf16.mxu0 %v2345_v33 }
 0x4f1   :  { %2348 = vmatpush3.bf16.msra.mxu0 %v2345_v33 }
 0x4f2   :  { %2350 = vmatprep.subr.bf16.mxu0 %v2349_v34  ;;  %v2530_v42 = vpop.eup %2529 }
 0x4f3   :  { %v2532_v2 = vpop.eup %2531  ;;  %v642_v3 = vmul.f32 %v2530_v42, %v2885_v16  ;;  %v799_v16 = vsub.s32 1, %v2769_v54 }
 0x4f4   :  { %v643_v5 = vmul.f32 %v2532_v2, %v2881_v14 }
 0x4f5   :  { %2352 = vmatpush3.bf16.msra.mxu0 %v2349_v34  ;;  %v800_v17 = vrot.slane %v2775_v56, %v799_v16 }
 0x4f6   :  { %2354 = vmatprep.subr.bf16.mxu0 %v2353_v41 }
 0x4f9   :  { %2356 = vmatpush3.bf16.msra.mxu0 %v2353_v41 }
 0x4fa   :  { %2358 = vmatprep.subr.bf16.mxu0 %v2357_v63 }
 0x4fc   :  { %2149 = vmatmul.mubr.msk.f32.vlgmr.msra.gmra.mrb[8].mxu0 %vm111_vm0, %v637_v45 }
 0x4fd   :  { %2151 = vmatprep.mubr.msk.f32.mxu0 %vm111_vm0, %v638_v59  ;;  %2360 = vmatpush3.bf16.msra.mxu0 %v2357_v63 }
 0x4fe   :  { %2362 = vmatprep.subr.bf16.mxu0 %v2361_v57 }
 0x500   :  { %2152 = vmatmul.mubr.msk.f32.gmra.mrb[10].mxu0 %vm111_vm0, %v639_v61 }
 0x501   :  { %2154 = vmatprep.mubr.msk.f32.mxu0 %vm111_vm0, %v640_v1  ;;  %2364 = vmatpush3.bf16.msra.mxu0 %v2361_v57 }
 0x504   :  { %2155 = vmatmul.mubr.msk.f32.gmra.mrb[12].mxu0 %vm111_vm0, %v641_v0 }
 0x505   :  { %2157 = vmatprep.mubr.msk.f32.mxu0 %vm111_vm0, %v642_v3 }
 0x508   :  { %2158 = vmatmul.mubr.msk.f32.gmra.mrb[14].mxu0 %vm111_vm0, %v643_v5 }
 0x5cf   :  { %v2150_v6 = vpop.f32.mrb[8].mxu0 }
 0x5d0   :  { %v758_v7 = vpop.f32.mrb[9].mxu0 }
 0x5d1   :  { %2168 = vmatprep.mubr.msk.f32.mxu0 %vm249_vm9, %v758_v7 }
 0x5d2   :  { %2169 = vmatmul.mubr.msk.f32.vlgmr.msra.gmra.mrb[16].mxu0 %vm249_vm9, %v2150_v6 }
 0x5d3   :  { %v2153_v8 = vpop.f32.mrb[10].mxu0 }
 0x5d4   :  { %v768_v10 = vpop.f32.mrb[11].mxu0 }
 0x5d5   :  { %2171 = vmatprep.mubr.msk.f32.mxu0 %vm249_vm9, %v768_v10 }
 0x5d6   :  { %2172 = vmatmul.mubr.msk.f32.gmra.mrb[18].mxu0 %vm249_vm9, %v2153_v8 }
 0x5d7   :  { %v2156_v11 = vpop.f32.mrb[12].mxu0 }
 0x5d8   :  { %v778_v12 = vpop.f32.mrb[13].mxu0 }
 0x5d9   :  { %2174 = vmatprep.mubr.msk.f32.mxu0 %vm249_vm9, %v778_v12 }
 0x5da   :  { %2175 = vmatmul.mubr.msk.f32.gmra.mrb[20].mxu0 %vm249_vm9, %v2156_v11 }
 0x5db   :  { %v2159_v14 = vpop.f32.mrb[14].mxu0 }
 0x5dc   :  { %v788_v15 = vpop.f32.mrb[15].mxu0 }
 0x5dd   :  { %2177 = vmatprep.mubr.msk.f32.mxu0 %vm249_vm9, %v788_v15 }
 0x5de   :  { %2178 = vmatmul.mubr.msk.f32.gmra.mrb[22].mxu0 %vm249_vm9, %v2159_v14 }
 0x6a5   :  { %v2170_v18 = vpop.f32.mrb[16].mxu0 }
 0x6a6   :  { %v897_v19 = vadd.f32 %v2170_v18, %v800_v17  ;;  %v891_v20 = vpop.f32.mrb[17].mxu0 }
 0x6a7   :  { %v892_v21 = vadd.f32 %v891_v20, %v800_v17 }
 0x6a8   :  { %v931_v22 = vadd.f32 %v2737_v46, %v897_v19 }
 0x6a9   :  { %v2173_v23 = vpop.f32.mrb[18].mxu0  ;;  %v930_v24 = vadd.f32 %v892_v21, %v2739_v47 }
 0x6aa   :  { %v907_v25 = vadd.f32 %v2173_v23, %v800_v17  ;;  %v901_v26 = vpop.f32.mrb[19].mxu0  ;;  %v941_v27 = vsel %vm249_vm9, %v931_v22, 0.0 }
 0x6ab   :  { %v902_v9 = vadd.f32 %v901_v26, %v800_v17  ;;  %942 = vadd.xlane.f32.xlu0 %v941_v27  ;;  %v938_v28 = vsel %vm249_vm9, %v930_v24, 0.0 }
 0x6ac   :  { %939 = vadd.xlane.f32.xlu1 %v938_v28  ;;  %v933_v29 = vadd.f32 %v2745_v48, %v907_v25 }
 0x6ad   :  { %v2176_v13 = vpop.f32.mrb[20].mxu0  ;;  %v932_v30 = vadd.f32 %v902_v9, %v2747_v49 }
 0x6ae   :  { %v917_v32 = vadd.f32 %v2176_v13, %v800_v17  ;;  %v911_v4 = vpop.f32.mrb[21].mxu0  ;;  %v947_v46 = vsel %vm249_vm9, %v933_v29, 0.0 }
 0x6af   :  { %v912_v33 = vadd.f32 %v911_v4, %v800_v17  ;;  %948 = vadd.xlane.f32.xlu0 %v947_v46  ;;  %v944_v47 = vsel %vm249_vm9, %v932_v30, 0.0  ;;  %v3004_v46 = vpack.i.bf16 %v2904_v39, %v2899_v37 }
 0x6b0   :  { %945 = vadd.xlane.f32.xlu1 %v944_v47  ;;  %v935_v34 = vadd.f32 %v2753_v50, %v917_v32 }
 0x6b1   :  { %v2179_v35 = vpop.f32.mrb[22].mxu0  ;;  %v934_v36 = vadd.f32 %v912_v33, %v2755_v51  ;;  %v3010_v33 = vpack.i.bf16 %v2916_v43, %v2911_v40 }
 0x6b2   :  { %v927_v41 = vadd.f32 %v2179_v35, %v800_v17  ;;  %v921_v63 = vpop.f32.mrb[23].mxu0  ;;  %v953_v48 = vsel %vm249_vm9, %v935_v34, 0.0 }
 0x6b3   :  { %v922_v38 = vadd.f32 %v921_v63, %v800_v17  ;;  %954 = vadd.xlane.f32.xlu0 %v953_v48  ;;  %v950_v49 = vsel %vm249_vm9, %v934_v36, 0.0 }
 0x6b4   :  { %951 = vadd.xlane.f32.xlu1 %v950_v49  ;;  %v937_v44 = vadd.f32 %v2761_v52, %v927_v41 }
 0x6b5   :  { %v936_v45 = vadd.f32 %v922_v38, %v2763_v53 }
 0x6b6   :  { %v959_v57 = vsel %vm249_vm9, %v937_v44, 0.0 }
 0x6b7   :  { %960 = vadd.xlane.f32.xlu0 %v959_v57  ;;  %v956_v50 = vsel %vm249_vm9, %v936_v45, 0.0 }
 0x6b8   :  { %957 = vadd.xlane.f32.xlu1 %v956_v50  ;;  %v1045_v50 = vsub.s32 2, %v2769_v54 }
 0x738   :  { %v943_v51 = vpop.xlane.xlu0 %942 }
 0x739   :  { %v964_v58 = vmul.f32 0.03125, %v943_v51  ;;  %v940_v59 = vpop.xlane.xlu1 %939 }
 0x73a   :  { %v963_v60 = vmul.f32 0.03125, %v940_v59 }
 0x73b   :  { %v2962_v61 = vsub.f32 %v931_v22, %v964_v58 }
 0x73c   :  { %v2964_v62 = vsub.f32 %v930_v24, %v963_v60  ;;  %v949_v1 = vpop.xlane.xlu0 %948  ;;  %v1057_v60 = vsub.s32 3, %v2769_v54 }
 0x73d   :  { %v966_v42 = vmul.f32 0.03125, %v949_v1  ;;  %v946_v0 = vpop.xlane.xlu1 %945  ;;  %v980_v52 = vmul.f32 %v2962_v61, %v2962_v61 }
 0x73e   :  { %v965_v53 = vmul.f32 0.03125, %v946_v0  ;;  %v979_v2 = vmul.f32 %v2964_v62, %v2964_v62 }
 0x73f   :  { %v2970_v3 = vsub.f32 %v933_v29, %v966_v42  ;;  %v990_v5 = vsel %vm249_vm9, %v980_v52, 0.0  ;;  %v1046_v52 = vrot.slane %v2775_v56, %v1045_v50 }
 0x740   :  { %v2973_v6 = vsub.f32 %v932_v30, %v965_v53  ;;  %v955_v7 = vpop.xlane.xlu0 %954  ;;  %991 = vadd.xlane.f32.xlu0 %v990_v5  ;;  %v987_v8 = vsel %vm249_vm9, %v979_v2, 0.0 }
 0x741   :  { %v968_v10 = vmul.f32 0.03125, %v955_v7  ;;  %988 = vadd.xlane.f32.xlu1 %v987_v8  ;;  %v952_v11 = vpop.xlane.xlu1 %951  ;;  %v982_v12 = vmul.f32 %v2970_v3, %v2970_v3 }
 0x742   :  { %v967_v14 = vmul.f32 0.03125, %v952_v11  ;;  %v981_v15 = vmul.f32 %v2973_v6, %v2973_v6 }
 0x743   :  { %v2980_v17 = vsub.f32 %v935_v34, %v968_v10  ;;  %v996_v18 = vsel %vm249_vm9, %v982_v12, 0.0  ;;  %v1058_v10 = vrot.slane %v2775_v56, %v1057_v60  ;;  %v1294_v60 = vld [vmem:[%s3321_s4 + $0x30] sm:$0xff] }
 0x744   :  { %v2983_v19 = vsub.f32 %v934_v36, %v967_v14  ;;  %997 = vadd.xlane.f32.xlu0 %v996_v18  ;;  %v961_v20 = vpop.xlane.xlu0 %960  ;;  %v993_v21 = vsel %vm249_vm9, %v981_v15, 0.0 }
 0x745   :  { %v970_v22 = vmul.f32 0.03125, %v961_v20  ;;  %994 = vadd.xlane.f32.xlu1 %v993_v21  ;;  %v958_v23 = vpop.xlane.xlu1 %957  ;;  %v984_v24 = vmul.f32 %v2980_v17, %v2980_v17 }
 0x746   :  { %v969_v25 = vmul.f32 0.03125, %v958_v23  ;;  %v983_v26 = vmul.f32 %v2983_v19, %v2983_v19 }
 0x747   :  { %v2990_v27 = vsub.f32 %v937_v44, %v970_v22  ;;  %v1002_v9 = vsel %vm249_vm9, %v984_v24, 0.0 }
 0x748   :  { %v2993_v28 = vsub.f32 %v936_v45, %v969_v25  ;;  %1003 = vadd.xlane.f32.xlu0 %v1002_v9  ;;  %v999_v29 = vsel %vm249_vm9, %v983_v26, 0.0 }
 0x749   :  { %1000 = vadd.xlane.f32.xlu1 %v999_v29  ;;  %v986_v13 = vmul.f32 %v2990_v27, %v2990_v27 }
 0x74a   :  { %v985_v30 = vmul.f32 %v2993_v28, %v2993_v28 }
 0x74b   :  { %v1008_v32 = vsel %vm249_vm9, %v986_v13, 0.0 }
 0x74c   :  { %1009 = vadd.xlane.f32.xlu0 %v1008_v32  ;;  %v1005_v4 = vsel %vm249_vm9, %v985_v30, 0.0 }
 0x74d   :  { %1006 = vadd.xlane.f32.xlu1 %v1005_v4 }
 0x75e   :  { %2482 = vrot.lane.b32.xlu1 %v3004_v46, %s2610_s22 }
 0x762   :  { %2487 = vrot.lane.b32.xlu0 %v3010_v33, %s2610_s22 }
 0x7cd   :  { %v992_v47 = vpop.xlane.xlu0 %991 }
 0x7ce   :  { %v1012_v34 = vmul.f32 0.03125, %v992_v47  ;;  %v989_v35 = vpop.xlane.xlu1 %988 }
 0x7cf   :  { %v1011_v36 = vmul.f32 0.03125, %v989_v35 }
 0x7d0   :  { %v1020_v41 = vadd.f32 1e-05, %v1012_v34 }
 0x7d1   :  { %v1019_v63 = vadd.f32 1e-05, %v1011_v36  ;;  %v998_v48 = vpop.xlane.xlu0 %997 }
 0x7d2   :  { %v1014_v38 = vmul.f32 0.03125, %v998_v48  ;;  %v995_v37 = vpop.xlane.xlu1 %994 }
 0x7d3   :  { %2533 = vrsqrt.f32 %v1019_v63  ;;  %v1013_v39 = vmul.f32 0.03125, %v995_v37 }
 0x7d4   :  { %2535 = vrsqrt.f32 %v1020_v41  ;;  %v1022_v49 = vadd.f32 1e-05, %v1014_v38 }
 0x7d5   :  { %v1021_v44 = vadd.f32 1e-05, %v1013_v39  ;;  %v1004_v45 = vpop.xlane.xlu0 %1003 }
 0x7d6   :  { %v1016_v40 = vmul.f32 0.03125, %v1004_v45  ;;  %v1001_v43 = vpop.xlane.xlu1 %1000  ;;  %v1289_v45 = vld [vmem:[%s3321_s4 + $0x8] sm:$0xff] }
 0x7d7   :  { %2537 = vrsqrt.f32 %v1021_v44  ;;  %v1015_v57 = vmul.f32 0.03125, %v1001_v43  ;;  %v1288_v44 = vld [vmem:[%s3321_s4] sm:$0xff]  ;;  %v1290_v43 = vld [vmem:[%s3321_s4 + $0x10] sm:$0xff] }
 0x7d8   :  { %2539 = vrsqrt.f32 %v1022_v49  ;;  %v1024_v51 = vadd.f32 1e-05, %v1016_v40  ;;  %v2373_v40 = vpack.c.bf16 %v1289_v45, %v1288_v44 }
 0x7d9   :  { %v1023_v58 = vadd.f32 1e-05, %v1015_v57  ;;  %v1010_v59 = vpop.xlane.xlu0 %1009  ;;  %v1291_v57 = vld [vmem:[%s3321_s4 + $0x18] sm:$0xff] }
 0x7da   :  { %v1018_v1 = vmul.f32 0.03125, %v1010_v59  ;;  %v1007_v42 = vpop.xlane.xlu1 %1006  ;;  %2374 = vmatprep.subr.bf16.mxu0 %v2373_v40  ;;  %v2377_v50 = vpack.c.bf16 %v1291_v57, %v1290_v43 }
 0x7db   :  { %2541 = vrsqrt.f32 %v1023_v58  ;;  %v1017_v0 = vmul.f32 0.03125, %v1007_v42  ;;  %2376 = vmatpush3.bf16.msra.mxu0 %v2373_v40  ;;  %v1293_v58 = vld [vmem:[%s3321_s4 + $0x28] sm:$0xff] }
 0x7dc   :  { %2543 = vrsqrt.f32 %v1024_v51  ;;  %v1026_v53 = vadd.f32 1e-05, %v1018_v1  ;;  %2378 = vmatprep.subr.bf16.mxu0 %v2377_v50  ;;  %v1292_v51 = vld [vmem:[%s3321_s4 + $0x20] sm:$0xff]  ;;  %v1295_v1 = vld [vmem:[%s3321_s4 + $0x38] sm:$0xff] }
 0x7dd   :  { %v2534_v2 = vpop.eup %2533  ;;  %v1025_v5 = vadd.f32 1e-05, %v1017_v0  ;;  %v2488_v7 = vpop.permute.xlu0 %2487  ;;  %v2381_v59 = vpack.c.bf16 %v1293_v58, %v1292_v51  ;;  %v2385_v42 = vpack.c.bf16 %v1295_v1, %v1294_v60  ;;  %v1069_v0 = vsub.s32 4, %v2769_v54 }
 0x7de   :  { %v2536_v8 = vpop.eup %2535  ;;  %v2483_v11 = vpop.permute.xlu1 %2482  ;;  %v2490_v12 = vunpack.i.h.bf16 %v2488_v7  ;;  %v2489_v14 = vunpack.i.l.bf16 %v2488_v7  ;;  %v1035_v15 = vmul.f32 %v2534_v2, %v2964_v62 }
 0x7df   :  { %2545 = vrsqrt.f32 %v1025_v5  ;;  %v2485_v18 = vunpack.i.h.bf16 %v2483_v11  ;;  %v2484_v20 = vunpack.i.l.bf16 %v2483_v11  ;;  %v1036_v23 = vmul.f32 %v2536_v8, %v2962_v61  ;;  %2380 = vmatpush3.bf16.msra.mxu0 %v2377_v50 }
 0x7e0   :  { %2547 = vrsqrt.f32 %v1026_v53  ;;  %v1047_v21 = vmul.f32 %v1046_v52, %v1035_v15  ;;  %v2369_v25 = vpack.c.bf16 %v2490_v12, %v2489_v14  ;;  %2382 = vmatprep.subr.bf16.mxu0 %v2381_v59 }
 0x7e1   :  { %v2538_v22 = vpop.eup %2537  ;;  %v2365_v24 = vpack.c.bf16 %v2485_v18, %v2484_v20  ;;  %v1048_v13 = vmul.f32 %v1046_v52, %v1036_v23 }
 0x7e2   :  { %v2540_v26 = vpop.eup %2539  ;;  %v3020_v9 = vadd.f32 %v1058_v10, %v1047_v21  ;;  %v1037_v29 = vmul.f32 %v2538_v22, %v2973_v6 }
 0x7e3   :  { %2366 = vmatprep.subr.bf16.mxu1 %v2365_v24  ;;  %v1038_v30 = vmul.f32 %v2540_v26, %v2970_v3  ;;  %v3027_v34 = vadd.f32 %v1058_v10, %v1048_v13  ;;  %2384 = vmatpush3.bf16.msra.mxu0 %v2381_v59 }
 0x7e4   :  { %2368 = vmatpush3.bf16.msra.mxu1 %v2365_v24  ;;  %2188 = vmatprep.mubr.msk.f32.mxu1 %vm249_vm9, %v3020_v9  ;;  %v1049_v4 = vmul.f32 %v1046_v52, %v1037_v29 }
 0x7e5   :  { %v2542_v62 = vpop.eup %2541  ;;  %2370 = vmatprep.subr.bf16.mxu1 %v2369_v25  ;;  %v1050_v35 = vmul.f32 %v1046_v52, %v1038_v30  ;;  %2386 = vmatprep.subr.bf16.mxu0 %v2385_v42 }
 0x7e6   :  { %v2544_v32 = vpop.eup %2543  ;;  %v1039_v61 = vmul.f32 %v2542_v62, %v2983_v19  ;;  %v3030_v41 = vadd.f32 %v1058_v10, %v1049_v4 }
 0x7e7   :  { %v1040_v6 = vmul.f32 %v2544_v32, %v2980_v17  ;;  %v3037_v3 = vadd.f32 %v1058_v10, %v1050_v35  ;;  %2388 = vmatpush3.bf16.msra.mxu0 %v2385_v42 }
 0x7e8   :  { %2372 = vmatpush3.bf16.msra.mxu1 %v2369_v25  ;;  %v1051_v63 = vmul.f32 %v1046_v52, %v1039_v61 }
 0x7e9   :  { %v2546_v47 = vpop.eup %2545  ;;  %v1052_v19 = vmul.f32 %v1046_v52, %v1040_v6 }
 0x7ea   :  { %v2548_v36 = vpop.eup %2547  ;;  %v1041_v48 = vmul.f32 %v2546_v47, %v2993_v28  ;;  %v3040_v37 = vadd.f32 %v1058_v10, %v1051_v63 }
 0x7eb   :  { %2189 = vmatmul.mubr.msk.f32.vlgmr.msra.gmra.mrb[16].mxu1 %vm249_vm9, %v3027_v34  ;;  %v1042_v38 = vmul.f32 %v2548_v36, %v2990_v27  ;;  %v3046_v28 = vadd.f32 %v1058_v10, %v1052_v19 }
 0x7ec   :  { %2191 = vmatprep.mubr.msk.f32.mxu1 %vm249_vm9, %v3030_v41  ;;  %v1053_v17 = vmul.f32 %v1046_v52, %v1041_v48 }
 0x7ed   :  { %v1054_v39 = vmul.f32 %v1046_v52, %v1042_v38  ;;  %v1070_v52 = vrot.slane %v2775_v56, %v1069_v0 }
 0x7ee   :  { %v3048_v49 = vadd.f32 %v1058_v10, %v1053_v17 }
 0x7ef   :  { %2192 = vmatmul.mubr.msk.f32.gmra.mrb[18].mxu1 %vm249_vm9, %v3037_v3  ;;  %v3054_v27 = vadd.f32 %v1058_v10, %v1054_v39 }
 0x7f0   :  { %2194 = vmatprep.mubr.msk.f32.mxu1 %vm249_vm9, %v3040_v37 }
 0x7f3   :  { %2195 = vmatmul.mubr.msk.f32.gmra.mrb[20].mxu1 %vm249_vm9, %v3046_v28 }
 0x7f4   :  { %2197 = vmatprep.mubr.msk.f32.mxu1 %vm249_vm9, %v3048_v49 }
 0x7f7   :  { %2198 = vmatmul.mubr.msk.f32.gmra.mrb[22].mxu1 %vm249_vm9, %v3054_v27 }
 0x7f8   :  { %2290 = vmatprep.mubr.msk.f32.mxu1 %vm2613_vm11, %v2609_v31 }
 0x8be   :  { %v2190_v53 = vpop.f32.mrb[16].mxu1 }
 0x8bf   :  { %v3084_v2 = vadd.f32 %v2190_v53, %v1070_v52  ;;  %v1177_v5 = vpop.f32.mrb[17].mxu1 }
 0x8c0   :  { %v3086_v7 = vadd.f32 %v1177_v5, %v1070_v52 }
 0x8c1   :  { %v1217_v8 = vmul.f32 %v3084_v2, %v3084_v2 }
 0x8c2   :  { %v1216_v10 = vmul.f32 %v3086_v7, %v3086_v7  ;;  %v2193_v11 = vpop.f32.mrb[18].mxu1 }
 0x8c3   :  { %v1225_v12 = vmul.f32 %v1217_v8, %v3084_v2  ;;  %v3093_v14 = vadd.f32 %v2193_v11, %v1070_v52  ;;  %v1187_v15 = vpop.f32.mrb[19].mxu1 }
 0x8c4   :  { %v1224_v56 = vmul.f32 %v1216_v10, %v3086_v7  ;;  %v3096_v18 = vadd.f32 %v1187_v15, %v1070_v52 }
 0x8c5   :  { %v1233_v20 = vmul.f32 0.044715, %v1225_v12  ;;  %v1219_v21 = vmul.f32 %v3093_v14, %v3093_v14 }
 0x8c6   :  { %v1232_v22 = vmul.f32 0.044715, %v1224_v56  ;;  %v1218_v23 = vmul.f32 %v3096_v18, %v3096_v18  ;;  %v2196_v24 = vpop.f32.mrb[20].mxu1 }
 0x8c7   :  { %v1241_v25 = vadd.f32 %v1233_v20, %v3084_v2  ;;  %v1227_v26 = vmul.f32 %v1219_v21, %v3093_v14  ;;  %v3104_v29 = vadd.f32 %v2196_v24, %v1070_v52  ;;  %v1197_v62 = vpop.f32.mrb[21].mxu1 }
 0x8c8   :  { %v1240_v13 = vadd.f32 %v1232_v22, %v3086_v7  ;;  %v1226_v30 = vmul.f32 %v1218_v23, %v3096_v18  ;;  %v3108_v32 = vadd.f32 %v1197_v62, %v1070_v52 }
 0x8c9   :  { %v1249_v4 = vmul.f32 0.7978846, %v1241_v25  ;;  %v1235_v61 = vmul.f32 0.044715, %v1227_v26  ;;  %v1221_v47 = vmul.f32 %v3104_v29, %v3104_v29 }
 0x8ca   :  { %v1248_v35 = vmul.f32 0.7978846, %v1240_v13  ;;  %v1234_v6 = vmul.f32 0.044715, %v1226_v30  ;;  %v1220_v36 = vmul.f32 %v3108_v32, %v3108_v32  ;;  %v2199_v63 = vpop.f32.mrb[22].mxu1 }
 0x8cb   :  { %2549 = vtanh.f32 %v1249_v4  ;;  %v1243_v48 = vadd.f32 %v1235_v61, %v3093_v14  ;;  %v1229_v19 = vmul.f32 %v1221_v47, %v3104_v29  ;;  %v3116_v38 = vadd.f32 %v2199_v63, %v1070_v52  ;;  %v1207_v17 = vpop.f32.mrb[23].mxu1 }
 0x8cc   :  { %2551 = vtanh.f32 %v1248_v35  ;;  %v1242_v39 = vadd.f32 %v1234_v6, %v3096_v18  ;;  %v1228_v44 = vmul.f32 %v1220_v36, %v3108_v32  ;;  %v1208_v45 = vadd.f32 %v1207_v17, %v1070_v52 }
 0x8cd   :  { %v1251_v40 = vmul.f32 0.7978846, %v1243_v48  ;;  %v1237_v43 = vmul.f32 0.044715, %v1229_v19  ;;  %v1223_v57 = vmul.f32 %v3116_v38, %v3116_v38 }
 0x8ce   :  { %v1250_v50 = vmul.f32 0.7978846, %v1242_v39  ;;  %v1236_v51 = vmul.f32 0.044715, %v1228_v44  ;;  %v1222_v58 = vmul.f32 %v1208_v45, %v1208_v45 }
 0x8cf   :  { %2553 = vtanh.f32 %v1251_v40  ;;  %v1245_v59 = vadd.f32 %v1237_v43, %v3104_v29  ;;  %v1231_v60 = vmul.f32 %v1223_v57, %v3116_v38 }
 0x8d0   :  { %2555 = vtanh.f32 %v1250_v50  ;;  %v1244_v1 = vadd.f32 %v1236_v51, %v3108_v32  ;;  %v1230_v42 = vmul.f32 %v1222_v58, %v1208_v45  ;;  %v1298_v51 = vsub.s32 5, %v2769_v54 }
 0x8d1   :  { %v1253_v0 = vmul.f32 0.7978846, %v1245_v59  ;;  %v1239_v53 = vmul.f32 0.044715, %v1231_v60 }
 0x8d2   :  { %v1252_v52 = vmul.f32 0.7978846, %v1244_v1  ;;  %v1238_v5 = vmul.f32 0.044715, %v1230_v42 }
 0x8d3   :  { %2557 = vtanh.f32 %v1253_v0  ;;  %v1247_v8 = vadd.f32 %v1239_v53, %v3116_v38 }
 0x8d4   :  { %2559 = vtanh.f32 %v1252_v52  ;;  %v1246_v10 = vadd.f32 %v1238_v5, %v1208_v45 }
 0x8d5   :  { %v2550_v11 = vpop.eup %2549  ;;  %v1255_v12 = vmul.f32 0.7978846, %v1247_v8 }
 0x8d6   :  { %v2552_v15 = vpop.eup %2551  ;;  %v1265_v56 = vadd.f32 1.0, %v2550_v11  ;;  %v1254_v20 = vmul.f32 0.7978846, %v1246_v10 }
 0x8d7   :  { %2561 = vtanh.f32 %v1255_v12  ;;  %v1264_v21 = vadd.f32 1.0, %v2552_v15 }
 0x8d8   :  { %v1273_v22 = vmul.f32 0.5, %v1265_v56  ;;  %2563 = vtanh.f32 %v1254_v20 }
 0x8d9   :  { %v2554_v23 = vpop.eup %2553  ;;  %v1272_v24 = vmul.f32 0.5, %v1264_v21 }
 0x8da   :  { %v2556_v25 = vpop.eup %2555  ;;  %v1267_v26 = vadd.f32 1.0, %v2554_v23  ;;  %v1281_v30 = vmul.f32 %v1273_v22, %v3084_v2 }
 0x8db   :  { %v1280_v62 = vmul.f32 %v1272_v24, %v3086_v7  ;;  %v1266_v13 = vadd.f32 1.0, %v2556_v25 }
 0x8dc   :  { %v1275_v4 = vmul.f32 0.5, %v1267_v26 }
 0x8dd   :  { %v2558_v61 = vpop.eup %2557  ;;  %2216 = vmatprep.mubr.msk.f32.mxu0 %vm111_vm0, %v1280_v62  ;;  %v1274_v47 = vmul.f32 0.5, %v1266_v13 }
 0x8de   :  { %v2560_v35 = vpop.eup %2559  ;;  %2217 = vmatmul.mubr.msk.f32.vlgmr.msra.gmra.mrb[24].mxu0 %vm111_vm0, %v1281_v30  ;;  %v1269_v6 = vadd.f32 1.0, %v2558_v61  ;;  %v1283_v48 = vmul.f32 %v1275_v4, %v3093_v14 }
 0x8df   :  { %v1282_v36 = vmul.f32 %v1274_v47, %v3096_v18  ;;  %v1268_v63 = vadd.f32 1.0, %v2560_v35 }
 0x8e0   :  { %v1277_v19 = vmul.f32 0.5, %v1269_v6 }
 0x8e1   :  { %v2562_v17 = vpop.eup %2561  ;;  %2219 = vmatprep.mubr.msk.f32.mxu0 %vm111_vm0, %v1282_v36  ;;  %v1276_v7 = vmul.f32 0.5, %v1268_v63 }
 0x8e2   :  { %v2564_v2 = vpop.eup %2563  ;;  %2220 = vmatmul.mubr.msk.f32.gmra.mrb[26].mxu0 %vm111_vm0, %v1283_v48  ;;  %v1271_v39 = vadd.f32 1.0, %v2562_v17  ;;  %v1285_v43 = vmul.f32 %v1277_v19, %v3104_v29 }
 0x8e3   :  { %v1284_v44 = vmul.f32 %v1276_v7, %v3108_v32  ;;  %v1270_v40 = vadd.f32 1.0, %v2564_v2  ;;  %v3145_v32 = vld [vmem:[%s3322_s5] sm:$0xff] }
 0x8e4   :  { %v1279_v57 = vmul.f32 0.5, %v1271_v39  ;;  %v1299_v29 = vrot.slane %v3145_v32, %v1298_v51 }
 0x8e5   :  { %2222 = vmatprep.mubr.msk.f32.mxu0 %vm111_vm0, %v1284_v44  ;;  %v1278_v18 = vmul.f32 0.5, %v1270_v40 }
 0x8e6   :  { %2223 = vmatmul.mubr.msk.f32.gmra.mrb[28].mxu0 %vm111_vm0, %v1285_v43  ;;  %v1287_v50 = vmul.f32 %v1279_v57, %v3116_v38 }
 0x8e7   :  { %v1286_v14 = vmul.f32 %v1278_v18, %v1208_v45 }
 0x8e9   :  { %2225 = vmatprep.mubr.msk.f32.mxu0 %vm111_vm0, %v1286_v14 }
 0x8ea   :  { %2226 = vmatmul.mubr.msk.f32.gmra.mrb[30].mxu0 %vm111_vm0, %v1287_v50 }
 0x8eb   :  { %2244 = vmatprep.mubr.msk.f32.mxu0 %vm2613_vm11, %v2609_v31 }
 0x9b1   :  { %v2218_v58 = vpop.f32.mrb[24].mxu0 }
 0x9b2   :  { %v1396_v59 = vadd.f32 %v2218_v58, %v1299_v29  ;;  %v1390_v60 = vpop.f32.mrb[25].mxu0 }
 0x9b3   :  { %v1391_v1 = vadd.f32 %v1390_v60, %v1299_v29 }
 0x9b4   :  { %v1430_v45 = vadd.f32 %v1396_v59, %v3027_v34 }
 0x9b5   :  { %v2221_v38 = vpop.f32.mrb[26].mxu0  ;;  %v1429_v42 = vadd.f32 %v1391_v1, %v3020_v9 }
 0x9b6   :  { %v1406_v0 = vadd.f32 %v2221_v38, %v1299_v29  ;;  %v1400_v53 = vpop.f32.mrb[27].mxu0  ;;  %v1440_v52 = vsel %vm249_vm9, %v1430_v45, 0.0 }
 0x9b7   :  { %v1401_v5 = vadd.f32 %v1400_v53, %v1299_v29  ;;  %1441 = vadd.xlane.f32.xlu0 %v1440_v52  ;;  %v1437_v8 = vsel %vm249_vm9, %v1429_v42, 0.0 }
 0x9b8   :  { %1438 = vadd.xlane.f32.xlu1 %v1437_v8  ;;  %v1432_v10 = vadd.f32 %v1406_v0, %v3037_v3 }
 0x9b9   :  { %v2224_v11 = vpop.f32.mrb[28].mxu0  ;;  %v1431_v12 = vadd.f32 %v1401_v5, %v3030_v41 }
 0x9ba   :  { %v1416_v15 = vadd.f32 %v2224_v11, %v1299_v29  ;;  %v1410_v56 = vpop.f32.mrb[29].mxu0  ;;  %v1446_v34 = vsel %vm249_vm9, %v1432_v10, 0.0 }
 0x9bb   :  { %v1411_v20 = vadd.f32 %v1410_v56, %v1299_v29  ;;  %1447 = vadd.xlane.f32.xlu0 %v1446_v34  ;;  %v1443_v9 = vsel %vm249_vm9, %v1431_v12, 0.0 }
 0x9bc   :  { %1444 = vadd.xlane.f32.xlu1 %v1443_v9  ;;  %v1434_v21 = vadd.f32 %v1416_v15, %v3046_v28  ;;  %v2612_v15 = vmov 0.0|0.0  }
 0x9bd   :  { %v2227_v22 = vpop.f32.mrb[30].mxu0  ;;  %v1433_v23 = vadd.f32 %v1411_v20, %v3040_v37  ;;  %2389 = vmatprep.subr.bf16.mxu0 %v2612_v15  ;;  %2407 = vmatprep.subr.bf16.mxu1 %v2612_v15 }
 0x9be   :  { %v1426_v24 = vadd.f32 %v2227_v22, %v1299_v29  ;;  %v1420_v25 = vpop.f32.mrb[31].mxu0  ;;  %v1452_v3 = vsel %vm249_vm9, %v1434_v21, 0.0 }
 0x9bf   :  { %v1421_v26 = vadd.f32 %v1420_v25, %v1299_v29  ;;  %1453 = vadd.xlane.f32.xlu0 %v1452_v3  ;;  %v1449_v41 = vsel %vm249_vm9, %v1433_v23, 0.0 }
 0x9c0   :  { %1450 = vadd.xlane.f32.xlu1 %v1449_v41  ;;  %v1436_v62 = vadd.f32 %v1426_v24, %v3054_v27 }
 0x9c1   :  { %v1435_v13 = vadd.f32 %v1421_v26, %v3048_v49 }
 0x9c2   :  { %v1458_v30 = vsel %vm249_vm9, %v1436_v62, 0.0 }
 0x9c3   :  { %1459 = vadd.xlane.f32.xlu0 %v1458_v30  ;;  %v1455_v28 = vsel %vm249_vm9, %v1435_v13, 0.0  ;;  %v1543_v30 = vsub.s32 6, %v2769_v54 }
 0x9c4   :  { %1456 = vadd.xlane.f32.xlu1 %v1455_v28 }
 0xa44   :  { %v1442_v37 = vpop.xlane.xlu0 %1441 }
 0xa45   :  { %v1462_v4 = vmul.f32 0.03125, %v1442_v37  ;;  %v1439_v61 = vpop.xlane.xlu1 %1438 }
 0xa46   :  { %v1461_v47 = vmul.f32 0.03125, %v1439_v61  ;;  %v1555_v61 = vsub.s32 7, %v2769_v54 }
 0xa47   :  { %v3164_v35 = vsub.f32 %v1430_v45, %v1462_v4 }
 0xa48   :  { %v3166_v6 = vsub.f32 %v1429_v42, %v1461_v47  ;;  %v1448_v36 = vpop.xlane.xlu0 %1447 }
 0xa49   :  { %v1464_v63 = vmul.f32 0.03125, %v1448_v36  ;;  %v1445_v48 = vpop.xlane.xlu1 %1444  ;;  %v1478_v49 = vmul.f32 %v3164_v35, %v3164_v35 }
 0xa4a   :  { %v1463_v27 = vmul.f32 0.03125, %v1445_v48  ;;  %v1477_v19 = vmul.f32 %v3166_v6, %v3166_v6  ;;  %v1544_v48 = vrot.slane %v3145_v32, %v1543_v30  ;;  %v1745_v30 = vld [vmem:[%s3324_s7] sm:$0xff] }
 0xa4b   :  { %v3172_v17 = vsub.f32 %v1432_v10, %v1464_v63  ;;  %v1488_v7 = vsel %vm249_vm9, %v1478_v49, 0.0 }
 0xa4c   :  { %v3175_v2 = vsub.f32 %v1431_v12, %v1463_v27  ;;  %v1454_v39 = vpop.xlane.xlu0 %1453  ;;  %1489 = vadd.xlane.f32.xlu0 %v1488_v7  ;;  %v1485_v44 = vsel %vm249_vm9, %v1477_v19, 0.0 }
 0xa4d   :  { %v1466_v40 = vmul.f32 0.03125, %v1454_v39  ;;  %1486 = vadd.xlane.f32.xlu1 %v1485_v44  ;;  %v1451_v43 = vpop.xlane.xlu1 %1450  ;;  %v1480_v57 = vmul.f32 %v3172_v17, %v3172_v17  ;;  %v1556_v44 = vrot.slane %v3145_v32, %v1555_v61 }
 0xa4e   :  { %v1465_v18 = vmul.f32 0.03125, %v1451_v43  ;;  %v1479_v14 = vmul.f32 %v3175_v2, %v3175_v2 }
 0xa4f   :  { %v3182_v50 = vsub.f32 %v1434_v21, %v1466_v40  ;;  %v1494_v51 = vsel %vm249_vm9, %v1480_v57, 0.0 }
 0xa50   :  { %v3185_v29 = vsub.f32 %v1433_v23, %v1465_v18  ;;  %1495 = vadd.xlane.f32.xlu0 %v1494_v51  ;;  %v1460_v58 = vpop.xlane.xlu0 %1459  ;;  %v1491_v59 = vsel %vm249_vm9, %v1479_v14, 0.0 }
 0xa51   :  { %v1468_v60 = vmul.f32 0.03125, %v1460_v58  ;;  %1492 = vadd.xlane.f32.xlu1 %v1491_v59  ;;  %v1457_v1 = vpop.xlane.xlu1 %1456  ;;  %v1482_v45 = vmul.f32 %v3182_v50, %v3182_v50 }
 0xa52   :  { %v1467_v38 = vmul.f32 0.03125, %v1457_v1  ;;  %v1481_v42 = vmul.f32 %v3185_v29, %v3185_v29 }
 0xa53   :  { %v3192_v0 = vsub.f32 %v1436_v62, %v1468_v60  ;;  %v1500_v53 = vsel %vm249_vm9, %v1482_v45, 0.0 }
 0xa54   :  { %v3195_v52 = vsub.f32 %v1435_v13, %v1467_v38  ;;  %1501 = vadd.xlane.f32.xlu0 %v1500_v53  ;;  %v1497_v5 = vsel %vm249_vm9, %v1481_v42, 0.0 }
 0xa55   :  { %1498 = vadd.xlane.f32.xlu1 %v1497_v5  ;;  %v1484_v8 = vmul.f32 %v3192_v0, %v3192_v0 }
 0xa56   :  { %v1483_v10 = vmul.f32 %v3195_v52, %v3195_v52 }
 0xa57   :  { %v1506_v11 = vsel %vm249_vm9, %v1484_v8, 0.0 }
 0xa58   :  { %1507 = vadd.xlane.f32.xlu0 %v1506_v11  ;;  %v1503_v12 = vsel %vm249_vm9, %v1483_v10, 0.0 }
 0xa59   :  { %1504 = vadd.xlane.f32.xlu1 %v1503_v12 }
 0xa6a   :  { %2492 = vrot.lane.b32.xlu1 %v3004_v46, %s2614_s18 }
 0xa6e   :  { %2497 = vrot.lane.b32.xlu0 %v3010_v33, %s2614_s18 }
 0xad9   :  { %v1490_v56 = vpop.xlane.xlu0 %1489 }
 0xada   :  { %v1510_v34 = vmul.f32 0.03125, %v1490_v56  ;;  %v1487_v20 = vpop.xlane.xlu1 %1486 }
 0xadb   :  { %v1509_v9 = vmul.f32 0.03125, %v1487_v20 }
 0xadc   :  { %v1518_v21 = vadd.f32 1e-05, %v1510_v34 }
 0xadd   :  { %v1517_v22 = vadd.f32 1e-05, %v1509_v9  ;;  %v1496_v23 = vpop.xlane.xlu0 %1495 }
 0xade   :  { %2565 = vrsqrt.f32 %v1518_v21  ;;  %v1512_v24 = vmul.f32 0.03125, %v1496_v23  ;;  %v1493_v25 = vpop.xlane.xlu1 %1492 }
 0xadf   :  { %2567 = vrsqrt.f32 %v1517_v22  ;;  %v1511_v3 = vmul.f32 0.03125, %v1493_v25 }
 0xae0   :  { %v1520_v26 = vadd.f32 1e-05, %v1512_v24 }
 0xae1   :  { %v1519_v41 = vadd.f32 1e-05, %v1511_v3  ;;  %v1502_v62 = vpop.xlane.xlu0 %1501 }
 0xae2   :  { %2569 = vrsqrt.f32 %v1520_v26  ;;  %v1514_v46 = vmul.f32 0.03125, %v1502_v62  ;;  %v1499_v13 = vpop.xlane.xlu1 %1498 }
 0xae3   :  { %2571 = vrsqrt.f32 %v1519_v41  ;;  %v1513_v33 = vmul.f32 0.03125, %v1499_v13 }
 0xae4   :  { %v1522_v28 = vadd.f32 1e-05, %v1514_v46 }
 0xae5   :  { %v1521_v37 = vadd.f32 1e-05, %v1513_v33  ;;  %v1508_v4 = vpop.xlane.xlu0 %1507 }
 0xae6   :  { %2573 = vrsqrt.f32 %v1522_v28  ;;  %v1516_v47 = vmul.f32 0.03125, %v1508_v4  ;;  %v1505_v36 = vpop.xlane.xlu1 %1504  ;;  %v1746_v28 = vld [vmem:[%s3324_s7 + $0x8] sm:$0xff]  ;;  %v1748_v4 = vld [vmem:[%s3324_s7 + $0x18] sm:$0xff] }
 0xae7   :  { %2575 = vrsqrt.f32 %v1521_v37  ;;  %v1515_v63 = vmul.f32 0.03125, %v1505_v36  ;;  %v1747_v37 = vld [vmem:[%s3324_s7 + $0x10] sm:$0xff]  ;;  %v1750_v36 = vld [vmem:[%s3324_s7 + $0x28] sm:$0xff] }
 0xae8   :  { %v2566_v49 = vpop.eup %2565  ;;  %v1524_v27 = vadd.f32 1e-05, %v1516_v47  ;;  %v2411_v61 = vpack.c.bf16 %v1748_v4, %v1747_v37  ;;  %v1749_v47 = vld [vmem:[%s3324_s7 + $0x20] sm:$0xff] }
 0xae9   :  { %v2568_v19 = vpop.eup %2567  ;;  %v1534_v7 = vmul.f32 %v2566_v49, %v3164_v35  ;;  %v1523_v39 = vadd.f32 1e-05, %v1515_v63  ;;  %v2498_v3 = vpop.permute.xlu0 %2497  ;;  %v2414_v63 = vpack.c.bf16 %v1750_v36, %v1749_v47  ;;  %v1752_v49 = vld [vmem:[%s3324_s7 + $0x38] sm:$0xff] }
 0xaea   :  { %v1533_v40 = vmul.f32 %v2568_v19, %v3166_v6  ;;  %2577 = vrsqrt.f32 %v1524_v27  ;;  %v2500_v41 = vunpack.i.h.bf16 %v2498_v3  ;;  %v2499_v62 = vunpack.i.l.bf16 %v2498_v3  ;;  %v1753_v19 = vld [vmem:[%s3324_s7 + $0x40] sm:$0xff] }
 0xaeb   :  { %2579 = vrsqrt.f32 %v1523_v39  ;;  %v1546_v43 = vmul.f32 %v1544_v48, %v1534_v7  ;;  %v1754_v7 = vld [vmem:[%s3324_s7 + $0x48] sm:$0xff] }
 0xaec   :  { %v2570_v57 = vpop.eup %2569  ;;  %v1545_v18 = vmul.f32 %v1544_v48, %v1533_v40  ;;  %v2405_v46 = vpack.c.bf16 %v2500_v41, %v2499_v62  ;;  %v2420_v39 = vpack.c.bf16 %v1754_v7, %v1753_v19  ;;  %v1756_v40 = vld [vmem:[%s3324_s7 + $0x58] sm:$0xff] }
 0xaed   :  { %v2572_v14 = vpop.eup %2571  ;;  %v1536_v51 = vmul.f32 %v2570_v57, %v3172_v17  ;;  %v1558_v58 = vadd.f32 %v1556_v44, %v1546_v43  ;;  %v1757_v57 = vld [vmem:[%s3324_s7 + $0x60] sm:$0xff] }
 0xaee   :  { %v1535_v59 = vmul.f32 %v2572_v14, %v3175_v2  ;;  %v1557_v60 = vadd.f32 %v1556_v44, %v1545_v18  ;;  %v1758_v18 = vld [vmem:[%s3324_s7 + $0x68] sm:$0xff] }
 0xaef   :  { %v1548_v1 = vmul.f32 %v1544_v48, %v1536_v51  ;;  %v2426_v14 = vpack.c.bf16 %v1758_v18, %v1757_v57  ;;  %v31_v51 = vld [vmem:[%s3322_s5 + $0x8] sm:$0x3]  ;;  %s2615_s5 = smov [#allocation2]  }
 0xaf0   :  { %v2574_v45 = vpop.eup %2573  ;;  %v2390_v35 = vpack.c.bf16 %v1558_v58, %v1557_v60  ;;  %v1547_v38 = vmul.f32 %v1544_v48, %v1535_v59  ;;  %v1641_v58 = vrot.slane %v31_v51, %v247_v55 }
 0xaf1   :  { %v2576_v42 = vpop.eup %2575  ;;  %v1538_v32 = vmul.f32 %v2574_v45, %v3182_v50  ;;  %v1560_v6 = vadd.f32 %v1556_v44, %v1548_v1  ;;  %v1759_v45 = vld [vmem:[%s3324_s7 + $0x70] sm:$0xff] }
 0xaf2   :  { %v1537_v53 = vmul.f32 %v2576_v42, %v3185_v29  ;;  %2391 = vmatpush3.bf16.msra.mxu0 %v2390_v35  ;;  %v1559_v5 = vadd.f32 %v1556_v44, %v1547_v38  ;;  %v2493_v29 = vpop.permute.xlu1 %2492  ;;  %v1760_v35 = vld [vmem:[%s3324_s7 + $0x78] sm:$0xff] }
 0xaf3   :  { %2392 = vmatprep.subr.bf16.mxu0 %v2612_v15  ;;  %v1550_v8 = vmul.f32 %v1544_v48, %v1538_v32  ;;  %v2495_v24 = vunpack.i.h.bf16 %v2493_v29  ;;  %v2494_v25 = vunpack.i.l.bf16 %v2493_v29 }
 0xaf4   :  { %v2578_v17 = vpop.eup %2577  ;;  %v2393_v10 = vpack.c.bf16 %v1560_v6, %v1559_v5  ;;  %v1549_v11 = vmul.f32 %v1544_v48, %v1537_v53 }
 0xaf5   :  { %v2580_v2 = vpop.eup %2579  ;;  %v1540_v12 = vmul.f32 %v2578_v17, %v3192_v0  ;;  %v1562_v56 = vadd.f32 %v1556_v44, %v1550_v8  ;;  %v2402_v26 = vpack.c.bf16 %v2495_v24, %v2494_v25 }
 0xaf6   :  { %v1539_v34 = vmul.f32 %v2580_v2, %v3195_v52  ;;  %2394 = vmatpush3.bf16.msra.mxu0 %v2393_v10  ;;  %v1561_v20 = vadd.f32 %v1556_v44, %v1549_v11  ;;  %v44_v52 = vld [vmem:[%s3323_s6 + $0x40] sm:$0xff]  ;;  %v1764_v11 = vrot.slane %v31_v51, %v799_v16 }
 0xaf7   :  { %2395 = vmatprep.subr.bf16.mxu0 %v2612_v15  ;;  %v1552_v50 = vmul.f32 %v1544_v48, %v1540_v12 }
 0xaf8   :  { %v2396_v9 = vpack.c.bf16 %v1562_v56, %v1561_v20  ;;  %v1551_v21 = vmul.f32 %v1544_v48, %v1539_v34  ;;  %v1751_v48 = vld [vmem:[%s3324_s7 + $0x30] sm:$0xff] }
 0xaf9   :  { %v1564_v22 = vadd.f32 %v1556_v44, %v1552_v50  ;;  %v2417_v27 = vpack.c.bf16 %v1752_v49, %v1751_v48 }
 0xafa   :  { %2397 = vmatpush3.bf16.msra.mxu0 %v2396_v9  ;;  %v1563_v23 = vadd.f32 %v1556_v44, %v1551_v21  ;;  %v1755_v44 = vld [vmem:[%s3324_s7 + $0x50] sm:$0xff]  ;;  %s1843_s7 = sshll.u32 %s2615_s5, 4  ;;  %s1844_s7 = int_to_ptr.vmem [resolvable:$true] %s1843_s7 }
 0xafb   :  { %2398 = vmatprep.subr.bf16.mxu0 %v2612_v15  ;;  %v2423_v43 = vpack.c.bf16 %v1756_v40, %v1755_v44  ;;  %p2589_p1 = scmp.lt.s32.totalorder %s1844_s7, %s1844_s7 }
 0xafc   :  { %v2399_v0 = vpack.c.bf16 %v1564_v22, %v1563_v23 }
 0xafe   :  { %2400 = vmatpush3.bf16.msra.mxu0 %v2399_v0 }
 0xaff   :  { %2401 = vmatprep.subr.bf16.mxu0 %v2612_v15 }
 0xb01   :  { %2245 = vmatmul.mubr.msk.f32.vlgmr.msra.gmra.mrb[32].mxu0 %vm111_vm0, %v44_v52 }
 0xb02   :  { %2403 = vmatpush3.bf16.msra.mxu0 %v2402_v26  ;;  %2255 = vmatprep.mubr.msk.f32.mxu0 %vm2613_vm11, %v2609_v31  ;;  %v2408_v31 = vpack.c.bf16 %v1746_v28, %v1745_v30 }
 0xb03   :  { %2404 = vmatprep.subr.bf16.mxu0 %v2612_v15 }
 0xb04   :  { %2409 = vmatpush3.bf16.msra.mxu1 %v2408_v31 }
 0xb05   :  { %2410 = vmatprep.subr.bf16.mxu1 %v2612_v15 }
 0xb06   :  { %2406 = vmatpush3.bf16.msra.mxu0 %v2405_v46 }
 0xb08   :  { %2412 = vmatpush3.bf16.msra.mxu1 %v2411_v61 }
 0xb09   :  { %2413 = vmatprep.subr.bf16.mxu1 %v2612_v15 }
 0xb0c   :  { %2415 = vmatpush3.bf16.msra.mxu1 %v2414_v63 }
 0xb0d   :  { %2416 = vmatprep.subr.bf16.mxu1 %v2612_v15 }
 0xb10   :  { %2418 = vmatpush3.bf16.msra.mxu1 %v2417_v27 }
 0xb11   :  { %2419 = vmatprep.subr.bf16.mxu1 %v2612_v15 }
 0xb14   :  { %2421 = vmatpush3.bf16.msra.mxu1 %v2420_v39 }
 0xb15   :  { %2422 = vmatprep.subr.bf16.mxu1 %v2612_v15 }
 0xb18   :  { %2424 = vmatpush3.bf16.msra.mxu1 %v2423_v43 }
 0xb19   :  { %2425 = vmatprep.subr.bf16.mxu1 %v2612_v15 }
 0xb1c   :  { %2427 = vmatpush3.bf16.msra.mxu1 %v2426_v14 }
 0xb1d   :  { %2428 = vmatprep.subr.bf16.mxu1 %v2612_v15  ;;  %v2429_v15 = vpack.c.bf16 %v1760_v35, %v1759_v45 }
 0xb20   :  { %2430 = vmatpush3.bf16.msra.mxu1 %v2429_v15 }
 0xbd4   :  { %v1634_v13 = vpop.f32.mrb[32].mxu0 }
 0xbd5   :  { %2256 = vmatmul.mubr.msk.f32.vlgmr.msra.gmra.mrb[34].mxu0 %vm249_vm9, %v1634_v13  ;;  %v2246_v33 = vpop.f32.mrb[33].mxu0 }
 0xca8   :  { %v1723_v59 = vpop.f32.mrb[34].mxu0 }
 0xca9   :  { %v1724_v60 = vadd.f32 %v1723_v59, %v1641_v58  ;;  %v2257_v1 = vpop.f32.mrb[35].mxu0 }
 0xcab   :  { %2581 = vtanh.f32 %v1724_v60 }
 0xcb5   :  { %v2582_v38 = vpop.eup %2581 }
 0xcb6   :  { %v1729_v42 = vrot.slane %v2582_v38, 2  ;;  %v1737_v32 = vrot.slane %v2582_v38, 6  ;;  %v1733_v55 = vrot.slane %v2582_v38, 4 }
 0xcb8   :  { %1730 = vrot.lane.b32.xlu1 %v1729_v42, %s2614_s18  ;;  %1738 = vrot.lane.b32.xlu0 %v1737_v32, %s2610_s22  ;;  %s2584_s22 = scalar_lea.vmem %s1844_s7, 32 }
 0xcb9   :  { %p2585_p0 = scmp.ne.s32.totalorder %s1844_s7, %s2584_s22  ;;  %p2590_p2 = scmp.lt.s32.totalorder %s2584_s22, %s2584_s22 }
 0xcbb   :  { %p2591_p3 = por %p2590_p2, %p2589_p1 }
 0xcbc   :  { %1734 = vrot.lane.b32.xlu1 %v1733_v55, %s2611_s1 }
 0xcbd   :  { %p2592_p4 = pnand %p2591_p3, %p2585_p0 }
 0xd2a   :  { %v1731_v6 = vpop.permute.xlu1 %1730  ;;  %v1739_v17 = vpop.permute.xlu0 %1738 }
 0xd2b   :  { %v1741_v53 = vsel %vm249_vm9, %v2582_v38, %v1731_v6 }
 0xd2e   :  { %v1735_v5 = vpop.permute.xlu1 %1734 }
 0xd2f   :  { %v1742_v8 = vsel %vm111_vm0, %v1741_v53, %v1735_v5 }
 0xd30   :  { %v1744_v10 = vsel %vm1743_vm12, %v1742_v8, %v1739_v17 }
 0xd31   :  { %2291 = vmatmul.mubr.f32.vlgmr.msra.gmra.mrb[24].mxu1 %v1744_v10 }
 0xe04   :  { %v1831_v2 = vpop.f32.mrb[24].mxu1 }
 0xe05   :  { %v1832_v12 = vadd.f32 %v1831_v2, %v1764_v11  ;;  %v2292_v56 = vpop.f32.mrb[25].mxu1 }
 0xe07   :  { %1836 = vst.msk [vmem:[#allocation2] sm:$0x3] %vm1835_vm13, %v1832_v12 }
 0xe08   :  { %2595 = shalt.err (!%p2592_p4)
}
 0xe09   :  { %s2596_s27 = scalar_lea.hbm %s3325_s8, 32 }
 0xe0a   :  { %p2597_p5 = scmp.ne.s32.totalorder %s3325_s8, %s2596_s27  ;;  %p2600_p6 = scmp.lt.u32.totalorder %s2596_s27, %s3325_s8 }
 0xe0c   :  { %p2602_p7 = pnand %p2600_p6, %p2597_p5 }
 0xe0e   :  { %2605 = shalt.err (!%p2602_p7)
}
 0xe0f   :  { %1846 = dma.vmem_to_hbm [thread:$0]  %s1844_s7, 32, %s3325_s8, [#allocation3]  }
 0xe10   :  { %2606 = dma.done.wait [#allocation3], 32  }
 0xe11   :  { %2607 = vsyncadd [#allocation3], 4294967264 }
 0xe12   :  { %1850 = vsyncpa [#allocation3], 1 }

</bundles_post_ra>
